<compile_context>
chip_gen: v7x
topology: tpu7x:2x2x1
jax: 0.10.0
libtpu: 0.0.40
codegen_flags: <defaults>
</compile_context>

<pallas_src>
import jax
import jax.numpy as jnp
from jax.experimental import pallas as pl
from jax.experimental.pallas import tpu as pltpu


def decoder_kernel(tok_ref,                       # (T,) int32 scalar-prefetch (SMEM)
                   emb_ref, h0_ref,
                   wi_ref, bi_ref,                # fused input-gate weights/bias
                   wh_ref, bh_ref,                # fused hidden-gate weights/bias
                   wo_ref, bo_ref,                # vocab projection (lane-padded)
                   logp_ref, hfin_ref):
    T = logp_ref.shape[0]
    H = h0_ref.shape[1]

    # ---- embedding gather (table is VMEM-resident) + relu, all T steps ----
    rows = [emb_ref[pl.ds(tok_ref[t], 1), :] for t in range(T)]       # T x (1, H)
    x_all = jnp.maximum(jnp.concatenate(rows, axis=0), 0.0)           # (T, H)

    # ---- batched input-side gate projections: one (T,H)x(H,3H_pad) matmul ----
    gi_all = jnp.dot(x_all, wi_ref[...],
                     preferred_element_type=jnp.float32) + bi_ref[...]  # (T, G_pad)

    # ---- sequential GRU recurrence: ONE fused MXU op per step ----
    # PyTorch gate order (r, z, n); gate columns [0:H | H:2H | 2H:3H | pad].
    h = h0_ref[...]                                                   # (1, H)
    hs = []
    for t in range(T):
        gi = gi_all[t:t + 1, :]                                       # static slice
        gh = jnp.dot(h, wh_ref[...],
                     preferred_element_type=jnp.float32) + bh_ref[...]
        r = jax.nn.sigmoid(gi[:, 0:H] + gh[:, 0:H])
        z = jax.nn.sigmoid(gi[:, H:2 * H] + gh[:, H:2 * H])
        n = jnp.tanh(gi[:, 2 * H:3 * H] + r * gh[:, 2 * H:3 * H])
        h = (1.0 - z) * n + z * h
        hs.append(h)
    hfin_ref[...] = h

    # ---- batched vocab projection + log_softmax over all T steps ----
    h_all = jnp.concatenate(hs, axis=0)                               # (T, H)
    logits = jnp.dot(h_all, wo_ref[...],
                     preferred_element_type=jnp.float32) + bo_ref[...]  # (T, V_pad)
    m = jnp.max(logits, axis=1, keepdims=True)
    s = logits - m
    logp_ref[...] = s - jnp.log(jnp.sum(jnp.exp(s), axis=1, keepdims=True))


def prepare_params(params):
    """One-time weight prep: transpose, fuse gates, pad to 128 lanes."""
    emb = params["embedding"].astype(jnp.float32)                     # (V, H)
    V, H = emb.shape
    G = 3 * H
    G_pad = ((G + 127) // 128) * 128
    V_pad = ((V + 127) // 128) * 128

    wih = params["gru_wih"].astype(jnp.float32)                       # (3H, H) rows r|z|n
    whh = params["gru_whh"].astype(jnp.float32)
    bih = params["gru_bih"].astype(jnp.float32)
    bhh = params["gru_bhh"].astype(jnp.float32)

    prep = {
        "emb": emb,
        "wi": jnp.zeros((H, G_pad), jnp.float32).at[:, :G].set(wih.T),
        "wh": jnp.zeros((H, G_pad), jnp.float32).at[:, :G].set(whh.T),
        "bi": jnp.zeros((1, G_pad), jnp.float32).at[0, :G].set(bih),
        "bh": jnp.zeros((1, G_pad), jnp.float32).at[0, :G].set(bhh),
        # vocab dim padded to 128 lanes; pad bias -1e30 (safe in f32 only).
        "wo": jnp.zeros((H, V_pad), jnp.float32).at[:, :V].set(
            params["out_w"].astype(jnp.float32).T),
        "bo": jnp.full((1, V_pad), -1e30, jnp.float32).at[0, :V].set(
            params["out_b"].astype(jnp.float32)),
    }
    return prep


@jax.jit
def decoder_rnn_forward(tokens, hidden, prep):
    """tokens: (T,) int32; hidden: (1,1,H); prep: output of prepare_params."""
    emb = prep["emb"]
    V, H = emb.shape
    G_pad = prep["wi"].shape[1]
    V_pad = prep["wo"].shape[1]
    T = tokens.shape[0]
    h0 = hidden.reshape(1, H)

    def const(shape):
        # whole array as one resident block; index_map gets (grid_i, tok_ref)
        return pl.BlockSpec(shape, lambda i, tok: (0,) * len(shape))

    logp_pad, h_final = pl.pallas_call(
        decoder_kernel,
        out_shape=(jax.ShapeDtypeStruct((T, V_pad), jnp.float32),
                   jax.ShapeDtypeStruct((1, H), jnp.float32)),
        grid_spec=pltpu.PrefetchScalarGridSpec(
            num_scalar_prefetch=1,
            grid=(1,),                               # single launch; T looped in-kernel
            in_specs=[
                const((V, H)),                       # embedding table (resident)
                const((1, H)),                       # h0
                const((H, G_pad)), const((1, G_pad)),   # fused input gates
                const((H, G_pad)), const((1, G_pad)),   # fused hidden gates
                const((H, V_pad)), const((1, V_pad)),   # vocab projection
            ],
            out_specs=[
                const((T, V_pad)),                   # all-step log-probs (lane-dense)
                const((1, H)),                       # final hidden
            ],
        ),
        compiler_params=pltpu.CompilerParams(
            dimension_semantics=("arbitrary",)),
    )(tokens.astype(jnp.int32), emb, h0,
      prep["wi"], prep["bi"], prep["wh"], prep["bh"], prep["wo"], prep["bo"])

    return logp_pad[:, :V], h_final.reshape(1, 1, H)


# -------------------- pure-JAX reference (for verification) --------------------
def decoder_rnn_reference(tokens, hidden, params):
    H = params["embedding"].shape[1]
    h = hidden.reshape(1, H)
    outs = []
    for t in range(tokens.shape[0]):
        emb = params["embedding"][tokens[t]][None, :]
        x = jax.nn.relu(emb)
        gi = x @ params["gru_wih"].T + params["gru_bih"][None, :]
        gh = h @ params["gru_whh"].T + params["gru_bhh"][None, :]
        i_r, i_z, i_n = gi[:, :H], gi[:, H:2 * H], gi[:, 2 * H:]
        h_r, h_z, h_n = gh[:, :H], gh[:, H:2 * H], gh[:, 2 * H:]
        r = jax.nn.sigmoid(i_r + h_r)
        z = jax.nn.sigmoid(i_z + h_z)
        n = jnp.tanh(i_n + r * h_n)
        h = (1.0 - z) * n + z * h
        logits = h @ params["out_w"].T + params["out_b"][None, :]
        outs.append(jax.nn.log_softmax(logits, axis=1))
    return jnp.concatenate(outs, axis=0), h.reshape(1, 1, H)


if __name__ == "__main__":
    # small shapes consistent with the module: hidden=32, n_words=20, T=8 steps
    H, V, T = 32, 20, 8

    key = jax.random.PRNGKey(0)
    ks = jax.random.split(key, 8)
    u = lambda k, shape: jax.random.uniform(k, shape, jnp.float32, -0.1, 0.1)

    params = {
        "embedding": u(ks[0], (V, H)),       # nn.Embedding(n_words, H)
        "gru_wih":   u(ks[1], (3 * H, H)),   # nn.GRU weight_ih_l0
        "gru_bih":   u(ks[2], (3 * H,)),
        "gru_whh":   u(ks[3], (3 * H, H)),   # nn.GRU weight_hh_l0
        "gru_bhh":   u(ks[4], (3 * H,)),
        "out_w":     u(ks[5], (V, H)),       # nn.Linear(H, n_words)
        "out_b":     u(ks[6], (V,)),
    }

    tokens = jax.random.randint(ks[7], (T,), 0, V, dtype=jnp.int32)  # decode sequence
    hidden = jnp.zeros((1, 1, H), jnp.float32)                       # initHidden

    prep = prepare_params(params)
    log_probs, h_final = decoder_rnn_forward(tokens, hidden, prep)
    jax.block_until_ready((log_probs, h_final))

    ref_lp, ref_h = decoder_rnn_reference(tokens, hidden, params)
    assert jnp.allclose(log_probs, ref_lp, atol=1e-5), "log_probs mismatch"
    assert jnp.allclose(h_final, ref_h, atol=1e-5), "hidden mismatch"

    print("KERNEL_OK")
</pallas_src>

<mosaic_0001>
module attributes {stable_mosaic.version = 11 : i64} {
  func.func @decoder_kernel(%arg0: i32, %arg1: memref<8xi32, #tpu.memory_space<smem>>, %arg2: memref<20x32xf32, #tpu.memory_space<vmem>>, %arg3: memref<1x32xf32, #tpu.memory_space<vmem>>, %arg4: memref<32x128xf32, #tpu.memory_space<vmem>>, %arg5: memref<1x128xf32, #tpu.memory_space<vmem>>, %arg6: memref<32x128xf32, #tpu.memory_space<vmem>>, %arg7: memref<1x128xf32, #tpu.memory_space<vmem>>, %arg8: memref<32x128xf32, #tpu.memory_space<vmem>>, %arg9: memref<1x128xf32, #tpu.memory_space<vmem>>, %arg10: memref<8x128xf32, #tpu.memory_space<vmem>>, %arg11: memref<1x32xf32, #tpu.memory_space<vmem>>) attributes {dimension_semantics = [#tpu.dimension_semantics<arbitrary>], iteration_bounds = array<i64: 1>, scalar_prefetch = 1 : i64, scratch_operands = 0 : i64, tpu.core_type = #tpu.core_type<tc>, window_params = [{pipeline_mode = #tpu.pipeline_mode<synchronous>, transform_indices = @transform_0, window_bounds = array<i64: 20, 32>}, {pipeline_mode = #tpu.pipeline_mode<synchronous>, transform_indices = @transform_1, window_bounds = array<i64: 1, 32>}, {pipeline_mode = #tpu.pipeline_mode<synchronous>, transform_indices = @transform_2, window_bounds = array<i64: 32, 128>}, {pipeline_mode = #tpu.pipeline_mode<synchronous>, transform_indices = @transform_3, window_bounds = array<i64: 1, 128>}, {pipeline_mode = #tpu.pipeline_mode<synchronous>, transform_indices = @transform_4, window_bounds = array<i64: 32, 128>}, {pipeline_mode = #tpu.pipeline_mode<synchronous>, transform_indices = @transform_5, window_bounds = array<i64: 1, 128>}, {pipeline_mode = #tpu.pipeline_mode<synchronous>, transform_indices = @transform_6, window_bounds = array<i64: 32, 128>}, {pipeline_mode = #tpu.pipeline_mode<synchronous>, transform_indices = @transform_7, window_bounds = array<i64: 1, 128>}, {pipeline_mode = #tpu.pipeline_mode<synchronous>, transform_indices = @transform_8, window_bounds = array<i64: 8, 128>}, {pipeline_mode = #tpu.pipeline_mode<synchronous>, transform_indices = @transform_9, window_bounds = array<i64: 1, 32>}]} {
    %c0 = arith.constant 0 : index
    %0 = memref.load %arg1[%c0] : memref<8xi32, #tpu.memory_space<smem>>
    %1 = arith.index_cast %0 : i32 to index
    %c0_0 = arith.constant 0 : index
    %2 = vector.load %arg2[%1, %c0_0] : memref<20x32xf32, #tpu.memory_space<vmem>>, vector<1x32xf32>
    %c1 = arith.constant 1 : index
    %3 = memref.load %arg1[%c1] : memref<8xi32, #tpu.memory_space<smem>>
    %4 = arith.index_cast %3 : i32 to index
    %c0_1 = arith.constant 0 : index
    %5 = vector.load %arg2[%4, %c0_1] : memref<20x32xf32, #tpu.memory_space<vmem>>, vector<1x32xf32>
    %c2 = arith.constant 2 : index
    %6 = memref.load %arg1[%c2] : memref<8xi32, #tpu.memory_space<smem>>
    %7 = arith.index_cast %6 : i32 to index
    %c0_2 = arith.constant 0 : index
    %8 = vector.load %arg2[%7, %c0_2] : memref<20x32xf32, #tpu.memory_space<vmem>>, vector<1x32xf32>
    %c3 = arith.constant 3 : index
    %9 = memref.load %arg1[%c3] : memref<8xi32, #tpu.memory_space<smem>>
    %10 = arith.index_cast %9 : i32 to index
    %c0_3 = arith.constant 0 : index
    %11 = vector.load %arg2[%10, %c0_3] : memref<20x32xf32, #tpu.memory_space<vmem>>, vector<1x32xf32>
    %c4 = arith.constant 4 : index
    %12 = memref.load %arg1[%c4] : memref<8xi32, #tpu.memory_space<smem>>
    %13 = arith.index_cast %12 : i32 to index
    %c0_4 = arith.constant 0 : index
    %14 = vector.load %arg2[%13, %c0_4] : memref<20x32xf32, #tpu.memory_space<vmem>>, vector<1x32xf32>
    %c5 = arith.constant 5 : index
    %15 = memref.load %arg1[%c5] : memref<8xi32, #tpu.memory_space<smem>>
    %16 = arith.index_cast %15 : i32 to index
    %c0_5 = arith.constant 0 : index
    %17 = vector.load %arg2[%16, %c0_5] : memref<20x32xf32, #tpu.memory_space<vmem>>, vector<1x32xf32>
    %c6 = arith.constant 6 : index
    %18 = memref.load %arg1[%c6] : memref<8xi32, #tpu.memory_space<smem>>
    %19 = arith.index_cast %18 : i32 to index
    %c0_6 = arith.constant 0 : index
    %20 = vector.load %arg2[%19, %c0_6] : memref<20x32xf32, #tpu.memory_space<vmem>>, vector<1x32xf32>
    %c7 = arith.constant 7 : index
    %21 = memref.load %arg1[%c7] : memref<8xi32, #tpu.memory_space<smem>>
    %22 = arith.index_cast %21 : i32 to index
    %c0_7 = arith.constant 0 : index
    %23 = vector.load %arg2[%22, %c0_7] : memref<20x32xf32, #tpu.memory_space<vmem>>, vector<1x32xf32>
    %24 = tpu.concatenate %2, %5, %8, %11, %14, %17, %20, %23 in 0 : vector<1x32xf32>, vector<1x32xf32>, vector<1x32xf32>, vector<1x32xf32>, vector<1x32xf32>, vector<1x32xf32>, vector<1x32xf32>, vector<1x32xf32> -> vector<8x32xf32>
    %cst = arith.constant 0.000000e+00 : f32
    %25 = vector.broadcast %cst : f32 to vector<8x32xf32>
    %26 = arith.maximumf %24, %25 : vector<8x32xf32>
    %c0_8 = arith.constant 0 : index
    %c0_9 = arith.constant 0 : index
    %27 = vector.load %arg4[%c0_8, %c0_9] : memref<32x128xf32, #tpu.memory_space<vmem>>, vector<32x128xf32>
    %cst_10 = arith.constant dense<0.000000e+00> : vector<8x128xf32>
    %28 = tpu.matmul %26, %27, %cst_10 {dimension_numbers = #tpu.dot_dimension_numbers<[1], [0], [0], [1], [0, 0, 1, 1], [], []>} : vector<8x32xf32>, vector<32x128xf32>, vector<8x128xf32> -> vector<8x128xf32>
    %c0_11 = arith.constant 0 : index
    %c0_12 = arith.constant 0 : index
    %29 = vector.load %arg5[%c0_11, %c0_12] : memref<1x128xf32, #tpu.memory_space<vmem>>, vector<1x128xf32>
    %30 = vector.broadcast %29 : vector<1x128xf32> to vector<8x128xf32>
    %31 = arith.addf %28, %30 : vector<8x128xf32>
    %c0_13 = arith.constant 0 : index
    %c0_14 = arith.constant 0 : index
    %32 = vector.load %arg3[%c0_13, %c0_14] : memref<1x32xf32, #tpu.memory_space<vmem>>, vector<1x32xf32>
    %33 = vector.extract_strided_slice %31 {offsets = [0, 0], sizes = [1, 128], strides = [1, 1]} : vector<8x128xf32> to vector<1x128xf32>
    %c0_15 = arith.constant 0 : index
    %c0_16 = arith.constant 0 : index
    %34 = vector.load %arg6[%c0_15, %c0_16] : memref<32x128xf32, #tpu.memory_space<vmem>>, vector<32x128xf32>
    %cst_17 = arith.constant dense<0.000000e+00> : vector<1x128xf32>
    %35 = tpu.matmul %32, %34, %cst_17 {dimension_numbers = #tpu.dot_dimension_numbers<[1], [0], [0], [1], [0, 0, 1, 1], [], []>} : vector<1x32xf32>, vector<32x128xf32>, vector<1x128xf32> -> vector<1x128xf32>
    %c0_18 = arith.constant 0 : index
    %c0_19 = arith.constant 0 : index
    %36 = vector.load %arg7[%c0_18, %c0_19] : memref<1x128xf32, #tpu.memory_space<vmem>>, vector<1x128xf32>
    %37 = arith.addf %35, %36 : vector<1x128xf32>
    %38 = vector.extract_strided_slice %33 {offsets = [0, 0], sizes = [1, 32], strides = [1, 1]} : vector<1x128xf32> to vector<1x32xf32>
    %39 = vector.extract_strided_slice %37 {offsets = [0, 0], sizes = [1, 32], strides = [1, 1]} : vector<1x128xf32> to vector<1x32xf32>
    %40 = arith.addf %38, %39 : vector<1x32xf32>
    %41 = arith.negf %40 : vector<1x32xf32>
    %42 = math.exp %41 : vector<1x32xf32>
    %cst_20 = arith.constant 1.000000e+00 : f32
    %43 = vector.broadcast %cst_20 : f32 to vector<1x32xf32>
    %44 = arith.addf %43, %42 : vector<1x32xf32>
    %45 = arith.divf %43, %44 : vector<1x32xf32>
    %46 = vector.extract_strided_slice %33 {offsets = [0, 32], sizes = [1, 32], strides = [1, 1]} : vector<1x128xf32> to vector<1x32xf32>
    %47 = vector.extract_strided_slice %37 {offsets = [0, 32], sizes = [1, 32], strides = [1, 1]} : vector<1x128xf32> to vector<1x32xf32>
    %48 = arith.addf %46, %47 : vector<1x32xf32>
    %49 = arith.negf %48 : vector<1x32xf32>
    %50 = math.exp %49 : vector<1x32xf32>
    %cst_21 = arith.constant 1.000000e+00 : f32
    %51 = vector.broadcast %cst_21 : f32 to vector<1x32xf32>
    %52 = arith.addf %51, %50 : vector<1x32xf32>
    %53 = arith.divf %51, %52 : vector<1x32xf32>
    %54 = vector.extract_strided_slice %33 {offsets = [0, 64], sizes = [1, 32], strides = [1, 1]} : vector<1x128xf32> to vector<1x32xf32>
    %55 = vector.extract_strided_slice %37 {offsets = [0, 64], sizes = [1, 32], strides = [1, 1]} : vector<1x128xf32> to vector<1x32xf32>
    %56 = arith.mulf %45, %55 : vector<1x32xf32>
    %57 = arith.addf %54, %56 : vector<1x32xf32>
    %58 = math.tanh %57 : vector<1x32xf32>
    %cst_22 = arith.constant 1.000000e+00 : f32
    %59 = vector.broadcast %cst_22 : f32 to vector<1x32xf32>
    %60 = arith.subf %59, %53 : vector<1x32xf32>
    %61 = arith.mulf %60, %58 : vector<1x32xf32>
    %62 = arith.mulf %53, %32 : vector<1x32xf32>
    %63 = arith.addf %61, %62 : vector<1x32xf32>
    %64 = vector.extract_strided_slice %31 {offsets = [1, 0], sizes = [1, 128], strides = [1, 1]} : vector<8x128xf32> to vector<1x128xf32>
    %c0_23 = arith.constant 0 : index
    %c0_24 = arith.constant 0 : index
    %65 = vector.load %arg6[%c0_23, %c0_24] : memref<32x128xf32, #tpu.memory_space<vmem>>, vector<32x128xf32>
    %cst_25 = arith.constant dense<0.000000e+00> : vector<1x128xf32>
    %66 = tpu.matmul %63, %65, %cst_25 {dimension_numbers = #tpu.dot_dimension_numbers<[1], [0], [0], [1], [0, 0, 1, 1], [], []>} : vector<1x32xf32>, vector<32x128xf32>, vector<1x128xf32> -> vector<1x128xf32>
    %c0_26 = arith.constant 0 : index
    %c0_27 = arith.constant 0 : index
    %67 = vector.load %arg7[%c0_26, %c0_27] : memref<1x128xf32, #tpu.memory_space<vmem>>, vector<1x128xf32>
    %68 = arith.addf %66, %67 : vector<1x128xf32>
    %69 = vector.extract_strided_slice %64 {offsets = [0, 0], sizes = [1, 32], strides = [1, 1]} : vector<1x128xf32> to vector<1x32xf32>
    %70 = vector.extract_strided_slice %68 {offsets = [0, 0], sizes = [1, 32], strides = [1, 1]} : vector<1x128xf32> to vector<1x32xf32>
    %71 = arith.addf %69, %70 : vector<1x32xf32>
    %72 = arith.negf %71 : vector<1x32xf32>
    %73 = math.exp %72 : vector<1x32xf32>
    %cst_28 = arith.constant 1.000000e+00 : f32
    %74 = vector.broadcast %cst_28 : f32 to vector<1x32xf32>
    %75 = arith.addf %74, %73 : vector<1x32xf32>
    %76 = arith.divf %74, %75 : vector<1x32xf32>
    %77 = vector.extract_strided_slice %64 {offsets = [0, 32], sizes = [1, 32], strides = [1, 1]} : vector<1x128xf32> to vector<1x32xf32>
    %78 = vector.extract_strided_slice %68 {offsets = [0, 32], sizes = [1, 32], strides = [1, 1]} : vector<1x128xf32> to vector<1x32xf32>
    %79 = arith.addf %77, %78 : vector<1x32xf32>
    %80 = arith.negf %79 : vector<1x32xf32>
    %81 = math.exp %80 : vector<1x32xf32>
    %cst_29 = arith.constant 1.000000e+00 : f32
    %82 = vector.broadcast %cst_29 : f32 to vector<1x32xf32>
    %83 = arith.addf %82, %81 : vector<1x32xf32>
    %84 = arith.divf %82, %83 : vector<1x32xf32>
    %85 = vector.extract_strided_slice %64 {offsets = [0, 64], sizes = [1, 32], strides = [1, 1]} : vector<1x128xf32> to vector<1x32xf32>
    %86 = vector.extract_strided_slice %68 {offsets = [0, 64], sizes = [1, 32], strides = [1, 1]} : vector<1x128xf32> to vector<1x32xf32>
    %87 = arith.mulf %76, %86 : vector<1x32xf32>
    %88 = arith.addf %85, %87 : vector<1x32xf32>
    %89 = math.tanh %88 : vector<1x32xf32>
    %cst_30 = arith.constant 1.000000e+00 : f32
    %90 = vector.broadcast %cst_30 : f32 to vector<1x32xf32>
    %91 = arith.subf %90, %84 : vector<1x32xf32>
    %92 = arith.mulf %91, %89 : vector<1x32xf32>
    %93 = arith.mulf %84, %63 : vector<1x32xf32>
    %94 = arith.addf %92, %93 : vector<1x32xf32>
    %95 = vector.extract_strided_slice %31 {offsets = [2, 0], sizes = [1, 128], strides = [1, 1]} : vector<8x128xf32> to vector<1x128xf32>
    %c0_31 = arith.constant 0 : index
    %c0_32 = arith.constant 0 : index
    %96 = vector.load %arg6[%c0_31, %c0_32] : memref<32x128xf32, #tpu.memory_space<vmem>>, vector<32x128xf32>
    %cst_33 = arith.constant dense<0.000000e+00> : vector<1x128xf32>
    %97 = tpu.matmul %94, %96, %cst_33 {dimension_numbers = #tpu.dot_dimension_numbers<[1], [0], [0], [1], [0, 0, 1, 1], [], []>} : vector<1x32xf32>, vector<32x128xf32>, vector<1x128xf32> -> vector<1x128xf32>
    %c0_34 = arith.constant 0 : index
    %c0_35 = arith.constant 0 : index
    %98 = vector.load %arg7[%c0_34, %c0_35] : memref<1x128xf32, #tpu.memory_space<vmem>>, vector<1x128xf32>
    %99 = arith.addf %97, %98 : vector<1x128xf32>
    %100 = vector.extract_strided_slice %95 {offsets = [0, 0], sizes = [1, 32], strides = [1, 1]} : vector<1x128xf32> to vector<1x32xf32>
    %101 = vector.extract_strided_slice %99 {offsets = [0, 0], sizes = [1, 32], strides = [1, 1]} : vector<1x128xf32> to vector<1x32xf32>
    %102 = arith.addf %100, %101 : vector<1x32xf32>
    %103 = arith.negf %102 : vector<1x32xf32>
    %104 = math.exp %103 : vector<1x32xf32>
    %cst_36 = arith.constant 1.000000e+00 : f32
    %105 = vector.broadcast %cst_36 : f32 to vector<1x32xf32>
    %106 = arith.addf %105, %104 : vector<1x32xf32>
    %107 = arith.divf %105, %106 : vector<1x32xf32>
    %108 = vector.extract_strided_slice %95 {offsets = [0, 32], sizes = [1, 32], strides = [1, 1]} : vector<1x128xf32> to vector<1x32xf32>
    %109 = vector.extract_strided_slice %99 {offsets = [0, 32], sizes = [1, 32], strides = [1, 1]} : vector<1x128xf32> to vector<1x32xf32>
    %110 = arith.addf %108, %109 : vector<1x32xf32>
    %111 = arith.negf %110 : vector<1x32xf32>
    %112 = math.exp %111 : vector<1x32xf32>
    %cst_37 = arith.constant 1.000000e+00 : f32
    %113 = vector.broadcast %cst_37 : f32 to vector<1x32xf32>
    %114 = arith.addf %113, %112 : vector<1x32xf32>
    %115 = arith.divf %113, %114 : vector<1x32xf32>
    %116 = vector.extract_strided_slice %95 {offsets = [0, 64], sizes = [1, 32], strides = [1, 1]} : vector<1x128xf32> to vector<1x32xf32>
    %117 = vector.extract_strided_slice %99 {offsets = [0, 64], sizes = [1, 32], strides = [1, 1]} : vector<1x128xf32> to vector<1x32xf32>
    %118 = arith.mulf %107, %117 : vector<1x32xf32>
    %119 = arith.addf %116, %118 : vector<1x32xf32>
    %120 = math.tanh %119 : vector<1x32xf32>
    %cst_38 = arith.constant 1.000000e+00 : f32
    %121 = vector.broadcast %cst_38 : f32 to vector<1x32xf32>
    %122 = arith.subf %121, %115 : vector<1x32xf32>
    %123 = arith.mulf %122, %120 : vector<1x32xf32>
    %124 = arith.mulf %115, %94 : vector<1x32xf32>
    %125 = arith.addf %123, %124 : vector<1x32xf32>
    %126 = vector.extract_strided_slice %31 {offsets = [3, 0], sizes = [1, 128], strides = [1, 1]} : vector<8x128xf32> to vector<1x128xf32>
    %c0_39 = arith.constant 0 : index
    %c0_40 = arith.constant 0 : index
    %127 = vector.load %arg6[%c0_39, %c0_40] : memref<32x128xf32, #tpu.memory_space<vmem>>, vector<32x128xf32>
    %cst_41 = arith.constant dense<0.000000e+00> : vector<1x128xf32>
    %128 = tpu.matmul %125, %127, %cst_41 {dimension_numbers = #tpu.dot_dimension_numbers<[1], [0], [0], [1], [0, 0, 1, 1], [], []>} : vector<1x32xf32>, vector<32x128xf32>, vector<1x128xf32> -> vector<1x128xf32>
    %c0_42 = arith.constant 0 : index
    %c0_43 = arith.constant 0 : index
    %129 = vector.load %arg7[%c0_42, %c0_43] : memref<1x128xf32, #tpu.memory_space<vmem>>, vector<1x128xf32>
    %130 = arith.addf %128, %129 : vector<1x128xf32>
    %131 = vector.extract_strided_slice %126 {offsets = [0, 0], sizes = [1, 32], strides = [1, 1]} : vector<1x128xf32> to vector<1x32xf32>
    %132 = vector.extract_strided_slice %130 {offsets = [0, 0], sizes = [1, 32], strides = [1, 1]} : vector<1x128xf32> to vector<1x32xf32>
    %133 = arith.addf %131, %132 : vector<1x32xf32>
    %134 = arith.negf %133 : vector<1x32xf32>
    %135 = math.exp %134 : vector<1x32xf32>
    %cst_44 = arith.constant 1.000000e+00 : f32
    %136 = vector.broadcast %cst_44 : f32 to vector<1x32xf32>
    %137 = arith.addf %136, %135 : vector<1x32xf32>
    %138 = arith.divf %136, %137 : vector<1x32xf32>
    %139 = vector.extract_strided_slice %126 {offsets = [0, 32], sizes = [1, 32], strides = [1, 1]} : vector<1x128xf32> to vector<1x32xf32>
    %140 = vector.extract_strided_slice %130 {offsets = [0, 32], sizes = [1, 32], strides = [1, 1]} : vector<1x128xf32> to vector<1x32xf32>
    %141 = arith.addf %139, %140 : vector<1x32xf32>
    %142 = arith.negf %141 : vector<1x32xf32>
    %143 = math.exp %142 : vector<1x32xf32>
    %cst_45 = arith.constant 1.000000e+00 : f32
    %144 = vector.broadcast %cst_45 : f32 to vector<1x32xf32>
    %145 = arith.addf %144, %143 : vector<1x32xf32>
    %146 = arith.divf %144, %145 : vector<1x32xf32>
    %147 = vector.extract_strided_slice %126 {offsets = [0, 64], sizes = [1, 32], strides = [1, 1]} : vector<1x128xf32> to vector<1x32xf32>
    %148 = vector.extract_strided_slice %130 {offsets = [0, 64], sizes = [1, 32], strides = [1, 1]} : vector<1x128xf32> to vector<1x32xf32>
    %149 = arith.mulf %138, %148 : vector<1x32xf32>
    %150 = arith.addf %147, %149 : vector<1x32xf32>
    %151 = math.tanh %150 : vector<1x32xf32>
    %cst_46 = arith.constant 1.000000e+00 : f32
    %152 = vector.broadcast %cst_46 : f32 to vector<1x32xf32>
    %153 = arith.subf %152, %146 : vector<1x32xf32>
    %154 = arith.mulf %153, %151 : vector<1x32xf32>
    %155 = arith.mulf %146, %125 : vector<1x32xf32>
    %156 = arith.addf %154, %155 : vector<1x32xf32>
    %157 = vector.extract_strided_slice %31 {offsets = [4, 0], sizes = [1, 128], strides = [1, 1]} : vector<8x128xf32> to vector<1x128xf32>
    %c0_47 = arith.constant 0 : index
    %c0_48 = arith.constant 0 : index
    %158 = vector.load %arg6[%c0_47, %c0_48] : memref<32x128xf32, #tpu.memory_space<vmem>>, vector<32x128xf32>
    %cst_49 = arith.constant dense<0.000000e+00> : vector<1x128xf32>
    %159 = tpu.matmul %156, %158, %cst_49 {dimension_numbers = #tpu.dot_dimension_numbers<[1], [0], [0], [1], [0, 0, 1, 1], [], []>} : vector<1x32xf32>, vector<32x128xf32>, vector<1x128xf32> -> vector<1x128xf32>
    %c0_50 = arith.constant 0 : index
    %c0_51 = arith.constant 0 : index
    %160 = vector.load %arg7[%c0_50, %c0_51] : memref<1x128xf32, #tpu.memory_space<vmem>>, vector<1x128xf32>
    %161 = arith.addf %159, %160 : vector<1x128xf32>
    %162 = vector.extract_strided_slice %157 {offsets = [0, 0], sizes = [1, 32], strides = [1, 1]} : vector<1x128xf32> to vector<1x32xf32>
    %163 = vector.extract_strided_slice %161 {offsets = [0, 0], sizes = [1, 32], strides = [1, 1]} : vector<1x128xf32> to vector<1x32xf32>
    %164 = arith.addf %162, %163 : vector<1x32xf32>
    %165 = arith.negf %164 : vector<1x32xf32>
    %166 = math.exp %165 : vector<1x32xf32>
    %cst_52 = arith.constant 1.000000e+00 : f32
    %167 = vector.broadcast %cst_52 : f32 to vector<1x32xf32>
    %168 = arith.addf %167, %166 : vector<1x32xf32>
    %169 = arith.divf %167, %168 : vector<1x32xf32>
    %170 = vector.extract_strided_slice %157 {offsets = [0, 32], sizes = [1, 32], strides = [1, 1]} : vector<1x128xf32> to vector<1x32xf32>
    %171 = vector.extract_strided_slice %161 {offsets = [0, 32], sizes = [1, 32], strides = [1, 1]} : vector<1x128xf32> to vector<1x32xf32>
    %172 = arith.addf %170, %171 : vector<1x32xf32>
    %173 = arith.negf %172 : vector<1x32xf32>
    %174 = math.exp %173 : vector<1x32xf32>
    %cst_53 = arith.constant 1.000000e+00 : f32
    %175 = vector.broadcast %cst_53 : f32 to vector<1x32xf32>
    %176 = arith.addf %175, %174 : vector<1x32xf32>
    %177 = arith.divf %175, %176 : vector<1x32xf32>
    %178 = vector.extract_strided_slice %157 {offsets = [0, 64], sizes = [1, 32], strides = [1, 1]} : vector<1x128xf32> to vector<1x32xf32>
    %179 = vector.extract_strided_slice %161 {offsets = [0, 64], sizes = [1, 32], strides = [1, 1]} : vector<1x128xf32> to vector<1x32xf32>
    %180 = arith.mulf %169, %179 : vector<1x32xf32>
    %181 = arith.addf %178, %180 : vector<1x32xf32>
    %182 = math.tanh %181 : vector<1x32xf32>
    %cst_54 = arith.constant 1.000000e+00 : f32
    %183 = vector.broadcast %cst_54 : f32 to vector<1x32xf32>
    %184 = arith.subf %183, %177 : vector<1x32xf32>
    %185 = arith.mulf %184, %182 : vector<1x32xf32>
    %186 = arith.mulf %177, %156 : vector<1x32xf32>
    %187 = arith.addf %185, %186 : vector<1x32xf32>
    %188 = vector.extract_strided_slice %31 {offsets = [5, 0], sizes = [1, 128], strides = [1, 1]} : vector<8x128xf32> to vector<1x128xf32>
    %c0_55 = arith.constant 0 : index
    %c0_56 = arith.constant 0 : index
    %189 = vector.load %arg6[%c0_55, %c0_56] : memref<32x128xf32, #tpu.memory_space<vmem>>, vector<32x128xf32>
    %cst_57 = arith.constant dense<0.000000e+00> : vector<1x128xf32>
    %190 = tpu.matmul %187, %189, %cst_57 {dimension_numbers = #tpu.dot_dimension_numbers<[1], [0], [0], [1], [0, 0, 1, 1], [], []>} : vector<1x32xf32>, vector<32x128xf32>, vector<1x128xf32> -> vector<1x128xf32>
    %c0_58 = arith.constant 0 : index
    %c0_59 = arith.constant 0 : index
    %191 = vector.load %arg7[%c0_58, %c0_59] : memref<1x128xf32, #tpu.memory_space<vmem>>, vector<1x128xf32>
    %192 = arith.addf %190, %191 : vector<1x128xf32>
    %193 = vector.extract_strided_slice %188 {offsets = [0, 0], sizes = [1, 32], strides = [1, 1]} : vector<1x128xf32> to vector<1x32xf32>
    %194 = vector.extract_strided_slice %192 {offsets = [0, 0], sizes = [1, 32], strides = [1, 1]} : vector<1x128xf32> to vector<1x32xf32>
    %195 = arith.addf %193, %194 : vector<1x32xf32>
    %196 = arith.negf %195 : vector<1x32xf32>
    %197 = math.exp %196 : vector<1x32xf32>
    %cst_60 = arith.constant 1.000000e+00 : f32
    %198 = vector.broadcast %cst_60 : f32 to vector<1x32xf32>
    %199 = arith.addf %198, %197 : vector<1x32xf32>
    %200 = arith.divf %198, %199 : vector<1x32xf32>
    %201 = vector.extract_strided_slice %188 {offsets = [0, 32], sizes = [1, 32], strides = [1, 1]} : vector<1x128xf32> to vector<1x32xf32>
    %202 = vector.extract_strided_slice %192 {offsets = [0, 32], sizes = [1, 32], strides = [1, 1]} : vector<1x128xf32> to vector<1x32xf32>
    %203 = arith.addf %201, %202 : vector<1x32xf32>
    %204 = arith.negf %203 : vector<1x32xf32>
    %205 = math.exp %204 : vector<1x32xf32>
    %cst_61 = arith.constant 1.000000e+00 : f32
    %206 = vector.broadcast %cst_61 : f32 to vector<1x32xf32>
    %207 = arith.addf %206, %205 : vector<1x32xf32>
    %208 = arith.divf %206, %207 : vector<1x32xf32>
    %209 = vector.extract_strided_slice %188 {offsets = [0, 64], sizes = [1, 32], strides = [1, 1]} : vector<1x128xf32> to vector<1x32xf32>
    %210 = vector.extract_strided_slice %192 {offsets = [0, 64], sizes = [1, 32], strides = [1, 1]} : vector<1x128xf32> to vector<1x32xf32>
    %211 = arith.mulf %200, %210 : vector<1x32xf32>
    %212 = arith.addf %209, %211 : vector<1x32xf32>
    %213 = math.tanh %212 : vector<1x32xf32>
    %cst_62 = arith.constant 1.000000e+00 : f32
    %214 = vector.broadcast %cst_62 : f32 to vector<1x32xf32>
    %215 = arith.subf %214, %208 : vector<1x32xf32>
    %216 = arith.mulf %215, %213 : vector<1x32xf32>
    %217 = arith.mulf %208, %187 : vector<1x32xf32>
    %218 = arith.addf %216, %217 : vector<1x32xf32>
    %219 = vector.extract_strided_slice %31 {offsets = [6, 0], sizes = [1, 128], strides = [1, 1]} : vector<8x128xf32> to vector<1x128xf32>
    %c0_63 = arith.constant 0 : index
    %c0_64 = arith.constant 0 : index
    %220 = vector.load %arg6[%c0_63, %c0_64] : memref<32x128xf32, #tpu.memory_space<vmem>>, vector<32x128xf32>
    %cst_65 = arith.constant dense<0.000000e+00> : vector<1x128xf32>
    %221 = tpu.matmul %218, %220, %cst_65 {dimension_numbers = #tpu.dot_dimension_numbers<[1], [0], [0], [1], [0, 0, 1, 1], [], []>} : vector<1x32xf32>, vector<32x128xf32>, vector<1x128xf32> -> vector<1x128xf32>
    %c0_66 = arith.constant 0 : index
    %c0_67 = arith.constant 0 : index
    %222 = vector.load %arg7[%c0_66, %c0_67] : memref<1x128xf32, #tpu.memory_space<vmem>>, vector<1x128xf32>
    %223 = arith.addf %221, %222 : vector<1x128xf32>
    %224 = vector.extract_strided_slice %219 {offsets = [0, 0], sizes = [1, 32], strides = [1, 1]} : vector<1x128xf32> to vector<1x32xf32>
    %225 = vector.extract_strided_slice %223 {offsets = [0, 0], sizes = [1, 32], strides = [1, 1]} : vector<1x128xf32> to vector<1x32xf32>
    %226 = arith.addf %224, %225 : vector<1x32xf32>
    %227 = arith.negf %226 : vector<1x32xf32>
    %228 = math.exp %227 : vector<1x32xf32>
    %cst_68 = arith.constant 1.000000e+00 : f32
    %229 = vector.broadcast %cst_68 : f32 to vector<1x32xf32>
    %230 = arith.addf %229, %228 : vector<1x32xf32>
    %231 = arith.divf %229, %230 : vector<1x32xf32>
    %232 = vector.extract_strided_slice %219 {offsets = [0, 32], sizes = [1, 32], strides = [1, 1]} : vector<1x128xf32> to vector<1x32xf32>
    %233 = vector.extract_strided_slice %223 {offsets = [0, 32], sizes = [1, 32], strides = [1, 1]} : vector<1x128xf32> to vector<1x32xf32>
    %234 = arith.addf %232, %233 : vector<1x32xf32>
    %235 = arith.negf %234 : vector<1x32xf32>
    %236 = math.exp %235 : vector<1x32xf32>
    %cst_69 = arith.constant 1.000000e+00 : f32
    %237 = vector.broadcast %cst_69 : f32 to vector<1x32xf32>
    %238 = arith.addf %237, %236 : vector<1x32xf32>
    %239 = arith.divf %237, %238 : vector<1x32xf32>
    %240 = vector.extract_strided_slice %219 {offsets = [0, 64], sizes = [1, 32], strides = [1, 1]} : vector<1x128xf32> to vector<1x32xf32>
    %241 = vector.extract_strided_slice %223 {offsets = [0, 64], sizes = [1, 32], strides = [1, 1]} : vector<1x128xf32> to vector<1x32xf32>
    %242 = arith.mulf %231, %241 : vector<1x32xf32>
    %243 = arith.addf %240, %242 : vector<1x32xf32>
    %244 = math.tanh %243 : vector<1x32xf32>
    %cst_70 = arith.constant 1.000000e+00 : f32
    %245 = vector.broadcast %cst_70 : f32 to vector<1x32xf32>
    %246 = arith.subf %245, %239 : vector<1x32xf32>
    %247 = arith.mulf %246, %244 : vector<1x32xf32>
    %248 = arith.mulf %239, %218 : vector<1x32xf32>
    %249 = arith.addf %247, %248 : vector<1x32xf32>
    %250 = vector.extract_strided_slice %31 {offsets = [7, 0], sizes = [1, 128], strides = [1, 1]} : vector<8x128xf32> to vector<1x128xf32>
    %c0_71 = arith.constant 0 : index
    %c0_72 = arith.constant 0 : index
    %251 = vector.load %arg6[%c0_71, %c0_72] : memref<32x128xf32, #tpu.memory_space<vmem>>, vector<32x128xf32>
    %cst_73 = arith.constant dense<0.000000e+00> : vector<1x128xf32>
    %252 = tpu.matmul %249, %251, %cst_73 {dimension_numbers = #tpu.dot_dimension_numbers<[1], [0], [0], [1], [0, 0, 1, 1], [], []>} : vector<1x32xf32>, vector<32x128xf32>, vector<1x128xf32> -> vector<1x128xf32>
    %c0_74 = arith.constant 0 : index
    %c0_75 = arith.constant 0 : index
    %253 = vector.load %arg7[%c0_74, %c0_75] : memref<1x128xf32, #tpu.memory_space<vmem>>, vector<1x128xf32>
    %254 = arith.addf %252, %253 : vector<1x128xf32>
    %255 = vector.extract_strided_slice %250 {offsets = [0, 0], sizes = [1, 32], strides = [1, 1]} : vector<1x128xf32> to vector<1x32xf32>
    %256 = vector.extract_strided_slice %254 {offsets = [0, 0], sizes = [1, 32], strides = [1, 1]} : vector<1x128xf32> to vector<1x32xf32>
    %257 = arith.addf %255, %256 : vector<1x32xf32>
    %258 = arith.negf %257 : vector<1x32xf32>
    %259 = math.exp %258 : vector<1x32xf32>
    %cst_76 = arith.constant 1.000000e+00 : f32
    %260 = vector.broadcast %cst_76 : f32 to vector<1x32xf32>
    %261 = arith.addf %260, %259 : vector<1x32xf32>
    %262 = arith.divf %260, %261 : vector<1x32xf32>
    %263 = vector.extract_strided_slice %250 {offsets = [0, 32], sizes = [1, 32], strides = [1, 1]} : vector<1x128xf32> to vector<1x32xf32>
    %264 = vector.extract_strided_slice %254 {offsets = [0, 32], sizes = [1, 32], strides = [1, 1]} : vector<1x128xf32> to vector<1x32xf32>
    %265 = arith.addf %263, %264 : vector<1x32xf32>
    %266 = arith.negf %265 : vector<1x32xf32>
    %267 = math.exp %266 : vector<1x32xf32>
    %cst_77 = arith.constant 1.000000e+00 : f32
    %268 = vector.broadcast %cst_77 : f32 to vector<1x32xf32>
    %269 = arith.addf %268, %267 : vector<1x32xf32>
    %270 = arith.divf %268, %269 : vector<1x32xf32>
    %271 = vector.extract_strided_slice %250 {offsets = [0, 64], sizes = [1, 32], strides = [1, 1]} : vector<1x128xf32> to vector<1x32xf32>
    %272 = vector.extract_strided_slice %254 {offsets = [0, 64], sizes = [1, 32], strides = [1, 1]} : vector<1x128xf32> to vector<1x32xf32>
    %273 = arith.mulf %262, %272 : vector<1x32xf32>
    %274 = arith.addf %271, %273 : vector<1x32xf32>
    %275 = math.tanh %274 : vector<1x32xf32>
    %cst_78 = arith.constant 1.000000e+00 : f32
    %276 = vector.broadcast %cst_78 : f32 to vector<1x32xf32>
    %277 = arith.subf %276, %270 : vector<1x32xf32>
    %278 = arith.mulf %277, %275 : vector<1x32xf32>
    %279 = arith.mulf %270, %249 : vector<1x32xf32>
    %280 = arith.addf %278, %279 : vector<1x32xf32>
    %c0_79 = arith.constant 0 : index
    %c0_80 = arith.constant 0 : index
    %281 = vector.load %arg11[%c0_79, %c0_80] : memref<1x32xf32, #tpu.memory_space<vmem>>, vector<1x32xf32>
    tpu.vector_store %arg11[%c0_79, %c0_80], %280 {strides = array<i32>} : memref<1x32xf32, #tpu.memory_space<vmem>>, vector<1x32xf32>,
    %282 = tpu.concatenate %63, %94, %125, %156, %187, %218, %249, %280 in 0 : vector<1x32xf32>, vector<1x32xf32>, vector<1x32xf32>, vector<1x32xf32>, vector<1x32xf32>, vector<1x32xf32>, vector<1x32xf32>, vector<1x32xf32> -> vector<8x32xf32>
    %c0_81 = arith.constant 0 : index
    %c0_82 = arith.constant 0 : index
    %283 = vector.load %arg8[%c0_81, %c0_82] : memref<32x128xf32, #tpu.memory_space<vmem>>, vector<32x128xf32>
    %cst_83 = arith.constant dense<0.000000e+00> : vector<8x128xf32>
    %284 = tpu.matmul %282, %283, %cst_83 {dimension_numbers = #tpu.dot_dimension_numbers<[1], [0], [0], [1], [0, 0, 1, 1], [], []>} : vector<8x32xf32>, vector<32x128xf32>, vector<8x128xf32> -> vector<8x128xf32>
    %c0_84 = arith.constant 0 : index
    %c0_85 = arith.constant 0 : index
    %285 = vector.load %arg9[%c0_84, %c0_85] : memref<1x128xf32, #tpu.memory_space<vmem>>, vector<1x128xf32>
    %286 = vector.broadcast %285 : vector<1x128xf32> to vector<8x128xf32>
    %287 = arith.addf %284, %286 : vector<8x128xf32>
    %cst_86 = arith.constant dense<0xFF800000> : vector<8xf32>
    %288 = vector.multi_reduction <maximumf>, %287, %cst_86 [1] : vector<8x128xf32> to vector<8xf32>
    %289 = vector.shape_cast %288 : vector<8xf32> to vector<8x1xf32>
    %290 = vector.broadcast %289 : vector<8x1xf32> to vector<8x128xf32>
    %291 = arith.subf %287, %290 : vector<8x128xf32>
    %292 = math.exp %291 : vector<8x128xf32>
    %cst_87 = arith.constant dense<0.000000e+00> : vector<8xf32>
    %293 = vector.multi_reduction <add>, %292, %cst_87 [1] : vector<8x128xf32> to vector<8xf32>
    %294 = vector.shape_cast %293 : vector<8xf32> to vector<8x1xf32>
    %295 = math.log %294 : vector<8x1xf32>
    %296 = vector.broadcast %295 : vector<8x1xf32> to vector<8x128xf32>
    %297 = arith.subf %291, %296 : vector<8x128xf32>
    %c0_88 = arith.constant 0 : index
    %c0_89 = arith.constant 0 : index
    %298 = vector.load %arg10[%c0_88, %c0_89] : memref<8x128xf32, #tpu.memory_space<vmem>>, vector<8x128xf32>
    tpu.vector_store %arg10[%c0_88, %c0_89], %297 {strides = array<i32>} : memref<8x128xf32, #tpu.memory_space<vmem>>, vector<8x128xf32>,
    return
  }
  func.func @transform_0(%arg0: i32, %arg1: memref<8xi32, #tpu.memory_space<smem>>) -> (i32, i32) {
    %c0_i32 = arith.constant 0 : i32
    %c0_i32_0 = arith.constant 0 : i32
    %c0_i32_1 = arith.constant 0 : i32
    return %c0_i32, %c0_i32_0 : i32, i32
  }
  func.func @transform_1(%arg0: i32, %arg1: memref<8xi32, #tpu.memory_space<smem>>) -> (i32, i32) {
    %c0_i32 = arith.constant 0 : i32
    %c0_i32_0 = arith.constant 0 : i32
    %c0_i32_1 = arith.constant 0 : i32
    return %c0_i32, %c0_i32_0 : i32, i32
  }
  func.func @transform_2(%arg0: i32, %arg1: memref<8xi32, #tpu.memory_space<smem>>) -> (i32, i32) {
    %c0_i32 = arith.constant 0 : i32
    %c0_i32_0 = arith.constant 0 : i32
    %c0_i32_1 = arith.constant 0 : i32
    return %c0_i32, %c0_i32_0 : i32, i32
  }
  func.func @transform_3(%arg0: i32, %arg1: memref<8xi32, #tpu.memory_space<smem>>) -> (i32, i32) {
    %c0_i32 = arith.constant 0 : i32
    %c0_i32_0 = arith.constant 0 : i32
    %c0_i32_1 = arith.constant 0 : i32
    return %c0_i32, %c0_i32_0 : i32, i32
  }
  func.func @transform_4(%arg0: i32, %arg1: memref<8xi32, #tpu.memory_space<smem>>) -> (i32, i32) {
    %c0_i32 = arith.constant 0 : i32
    %c0_i32_0 = arith.constant 0 : i32
    %c0_i32_1 = arith.constant 0 : i32
    return %c0_i32, %c0_i32_0 : i32, i32
  }
  func.func @transform_5(%arg0: i32, %arg1: memref<8xi32, #tpu.memory_space<smem>>) -> (i32, i32) {
    %c0_i32 = arith.constant 0 : i32
    %c0_i32_0 = arith.constant 0 : i32
    %c0_i32_1 = arith.constant 0 : i32
    return %c0_i32, %c0_i32_0 : i32, i32
  }
  func.func @transform_6(%arg0: i32, %arg1: memref<8xi32, #tpu.memory_space<smem>>) -> (i32, i32) {
    %c0_i32 = arith.constant 0 : i32
    %c0_i32_0 = arith.constant 0 : i32
    %c0_i32_1 = arith.constant 0 : i32
    return %c0_i32, %c0_i32_0 : i32, i32
  }
  func.func @transform_7(%arg0: i32, %arg1: memref<8xi32, #tpu.memory_space<smem>>) -> (i32, i32) {
    %c0_i32 = arith.constant 0 : i32
    %c0_i32_0 = arith.constant 0 : i32
    %c0_i32_1 = arith.constant 0 : i32
    return %c0_i32, %c0_i32_0 : i32, i32
  }
  func.func @transform_8(%arg0: i32, %arg1: memref<8xi32, #tpu.memory_space<smem>>) -> (i32, i32) {
    %c0_i32 = arith.constant 0 : i32
    %c0_i32_0 = arith.constant 0 : i32
    %c0_i32_1 = arith.constant 0 : i32
    return %c0_i32, %c0_i32_0 : i32, i32
  }
  func.func @transform_9(%arg0: i32, %arg1: memref<8xi32, #tpu.memory_space<smem>>) -> (i32, i32) {
    %c0_i32 = arith.constant 0 : i32
    %c0_i32_0 = arith.constant 0 : i32
    %c0_i32_1 = arith.constant 0 : i32
    return %c0_i32, %c0_i32_0 : i32, i32
  }
}

</mosaic_0001>

<bundles_post_ra>
// kernel: decoder_rnn_forward.1
= control target key start
LH: loop header
LB: loop body
LE: loop exit
PB: predicated region body
PF: predicated region fallthrough
CT: control target
= control target key end

     0   :  { %s2146_s0 = inlined_call_operand.vmem [shape: s32[8], index: 0, kind: input, shape index: {}]   ;;  %s2147_s1 = inlined_call_operand.hbm [shape: f32[20,32], index: 1, kind: input, shape index: {}]   ;;  %s2148_s2 = inlined_call_operand.vmem [shape: f32[1,32], index: 2, kind: input, shape index: {}]   ;;  %s2149_s3 = inlined_call_operand.hbm [shape: f32[32,128], index: 3, kind: input, shape index: {}]   ;;  %s2150_s4 = inlined_call_operand.hbm [shape: f32[1,128], index: 4, kind: input, shape index: {}]   ;;  %s2151_s5 = inlined_call_operand.hbm [shape: f32[32,128], index: 5, kind: input, shape index: {}]   ;;  %s2152_s6 = inlined_call_operand.hbm [shape: f32[1,128], index: 6, kind: input, shape index: {}]   ;;  %s2153_s7 = inlined_call_operand.vmem [shape: f32[32,128], index: 7, kind: input, shape index: {}]   ;;  %s2154_s8 = inlined_call_operand.hbm [shape: f32[1,128], index: 8, kind: input, shape index: {}]   ;;  %s2155_s9 = inlined_call_operand.hbm [shape: f32[8,128], index: 9, kind: output, shape index: {0}]   ;;  %s2156_s10 = inlined_call_operand.hbm [shape: f32[1,32], index: 10, kind: output, shape index: {1}]  }
   0x1   :  { %s16_s15 = sshll.u32 %s2146_s0, 4  ;;  %s17_s15 = int_to_ptr.vmem [resolvable:$true] %s16_s15 }
   0x2   :  { %s1580_s16 = scalar_lea.vmem %s17_s15, 16  ;;  %p1585_p1 = scmp.lt.s32.totalorder %s17_s15, %s17_s15 }
   0x3   :  { %p1581_p0 = scmp.ne.s32.totalorder %s17_s15, %s1580_s16  ;;  %p1586_p2 = scmp.lt.s32.totalorder %s1580_s16, %s1580_s16 }
   0x5   :  { %p1587_p3 = por %p1586_p2, %p1585_p1 }
   0x7   :  { %p1588_p4 = pnand %p1587_p3, %p1581_p0 }
   0x9   :  { %1591 = shalt.err (!%p1588_p4)  }
   0xa   :  { %s1782_s17 = smov [#allocation3]  }
   0xb   :  { %19 = dma.vmem_to_smem %s17_s15, 16, %s1782_s17, [#allocation2] }
   0xc   :  { %1768 = dma.done.wait [#allocation2], 16 }
   0xd   :  { %1769 = vsyncadd [#allocation2], 4294967280 }
   0xe   :  { %21 = sfence }
   0xf   :  { %22 = vsyncpa [#allocation5], 0 }
  0x10   :  { %23 = vsyncpa [#allocation8], 0 }
  0x11   :  { %24 = vsyncpa [#allocation11], 0 }
  0x12   :  { %25 = vsyncpa [#allocation14], 0 }
  0x13   :  { %26 = vsyncpa [#allocation6], 0 }
  0x14   :  { %27 = vsyncpa [#allocation17], 0  ;;  %s1783_s0 = smov [#allocation7]   ;;  %s1784_s19 = smov [#allocation10]  }
  0x15   :  { %s47_s18 = sshll.u32 %s1783_s0, 4  ;;  %s69_s20 = sshll.u32 %s1784_s19, 4  ;;  %s48_s18 = int_to_ptr.vmem [resolvable:$true] %s47_s18  ;;  %s1857_s20 = int_to_ptr.vmem [resolvable:$true] %s69_s20 }
  0x16   :  { %s1592_s23 = scalar_lea.hbm %s2149_s3, 512 }
  0x17   :  { %p1593_p5 = scmp.ne.s32.totalorder %s2149_s3, %s1592_s23  ;;  %p1596_p6 = scmp.lt.u32.totalorder %s1592_s23, %s2149_s3 }
  0x19   :  { %p1598_p7 = pnand %p1596_p6, %p1593_p5 }
  0x1b   :  { %1601 = shalt.err (!%p1598_p7)
}
  0x1c   :  { %s1602_s28 = scalar_lea.vmem %s48_s18, 512  ;;  %p1607_p9 = scmp.lt.s32.totalorder %s48_s18, %s48_s18 }
  0x1d   :  { %p1603_p8 = scmp.ne.s32.totalorder %s48_s18, %s1602_s28  ;;  %p1608_p10 = scmp.lt.s32.totalorder %s1602_s28, %s1602_s28 }
  0x1f   :  { %p1609_p11 = por %p1608_p10, %p1607_p9 }
  0x21   :  { %p1610_p12 = pnand %p1609_p11, %p1603_p8 }
  0x23   :  { %1613 = shalt.err (!%p1610_p12)
}
  0x24   :  { %s1785_s29 = smov 128   ;;  %s1786_s30 = smov 8  }
  0x25   :  { %53 = dma.hbm_to_vmem [thread:$0]  %s2149_s3, 512, %s48_s18, [#allocation8], %s1785_s29, %s1785_s29, %s1786_s30  }
  0x26   :  { %s1614_s15 = scalar_lea.hbm %s2151_s5, 512 }
  0x27   :  { %p1615_p13 = scmp.ne.s32.totalorder %s2151_s5, %s1614_s15  ;;  %p1618_p0 = scmp.lt.u32.totalorder %s1614_s15, %s2151_s5 }
  0x29   :  { %p1620_p1 = pnand %p1618_p0, %p1615_p13 }
  0x2b   :  { %1623 = shalt.err (!%p1620_p1)
}
  0x2c   :  { %s1624_s21 = scalar_lea.vmem %s1857_s20, 512  ;;  %p1629_p3 = scmp.lt.s32.totalorder %s1857_s20, %s1857_s20 }
  0x2d   :  { %p1625_p2 = scmp.ne.s32.totalorder %s1857_s20, %s1624_s21  ;;  %p1630_p4 = scmp.lt.s32.totalorder %s1624_s21, %s1624_s21 }
  0x2f   :  { %p1631_p5 = por %p1630_p4, %p1629_p3 }
  0x31   :  { %p1632_p6 = pnand %p1631_p5, %p1625_p2 }
  0x33   :  { %1635 = shalt.err (!%p1632_p6)
}
  0x34   :  { %75 = dma.hbm_to_vmem [thread:$0]  %s2151_s5, 512, %s1857_s20, [#allocation11], %s1785_s29, %s1785_s29, %s1786_s30  }
  0x35   :  { %s1787_s22 = smov [#allocation4]   ;;  %s1788_s24 = smov [#allocation9]  }
  0x36   :  { %s33_s23 = sshll.u32 %s1787_s22, 4  ;;  %s60_s25 = sshll.u32 %s1788_s24, 4  ;;  %s34_s23 = int_to_ptr.vmem [resolvable:$true] %s33_s23  ;;  %s61_s25 = int_to_ptr.vmem [resolvable:$true] %s60_s25 }
  0x37   :  { %s1636_s28 = scalar_lea.hbm %s2147_s1, 384 }
  0x38   :  { %p1637_p7 = scmp.ne.s32.totalorder %s2147_s1, %s1636_s28  ;;  %p1640_p8 = scmp.lt.u32.totalorder %s1636_s28, %s2147_s1 }
  0x3a   :  { %p1642_p9 = pnand %p1640_p8, %p1637_p7 }
  0x3c   :  { %1645 = shalt.err (!%p1642_p9)
}
  0x3d   :  { %s1646_s5 = scalar_lea.vmem %s34_s23, 384  ;;  %p1651_p11 = scmp.lt.s32.totalorder %s34_s23, %s34_s23 }
  0x3e   :  { %p1647_p10 = scmp.ne.s32.totalorder %s34_s23, %s1646_s5  ;;  %p1652_p12 = scmp.lt.s32.totalorder %s1646_s5, %s1646_s5 }
  0x40   :  { %p1653_p13 = por %p1652_p12, %p1651_p11 }
  0x42   :  { %p1654_p0 = pnand %p1653_p13, %p1647_p10 }
  0x44   :  { %1657 = shalt.err (!%p1654_p0)
}
  0x45   :  { %39 = dma.hbm_to_vmem [thread:$0]  %s2147_s1, 384, %s34_s23, [#allocation5], %s1785_s29, %s1785_s29, %s1786_s30  }
  0x46   :  { %s1658_s0 = scalar_lea.hbm %s2150_s4, 16 }
  0x47   :  { %p1659_p1 = scmp.ne.s32.totalorder %s2150_s4, %s1658_s0  ;;  %p1662_p2 = scmp.lt.u32.totalorder %s1658_s0, %s2150_s4 }
  0x49   :  { %p1664_p3 = pnand %p1662_p2, %p1659_p1 }
  0x4b   :  { %1667 = shalt.err (!%p1664_p3)
}
  0x4c   :  { %s1668_s22 = scalar_lea.vmem %s61_s25, 16  ;;  %s1672_s24 = scalar_lea.vmem %s61_s25, 32 }
  0x4d   :  { %p1669_p4 = scmp.ne.s32.totalorder %s61_s25, %s1668_s22  ;;  %p1673_p5 = scmp.lt.s32.totalorder %s61_s25, %s61_s25 }
  0x4e   :  { %p1674_p6 = scmp.lt.s32.totalorder %s1672_s24, %s1668_s22 }
  0x50   :  { %p1675_p7 = por %p1674_p6, %p1673_p5 }
  0x52   :  { %p1676_p8 = pnand %p1675_p7, %p1669_p4 }
  0x54   :  { %1679 = shalt.err (!%p1676_p8)
}
  0x55   :  { %63 = dma.hbm_to_vmem [thread:$0]  %s2150_s4, 16, %s61_s25, [#allocation8]  }
  0x56   :  { %s1789_s30 = smov [#allocation12]   ;;  %s1790_s26 = smov [#allocation13]  }
  0x57   :  { %s82_s23 = sshll.u32 %s1789_s30, 4  ;;  %s94_s27 = sshll.u32 %s1790_s26, 4  ;;  %s83_s23 = int_to_ptr.vmem [resolvable:$true] %s82_s23  ;;  %s95_s27 = int_to_ptr.vmem [resolvable:$true] %s94_s27 }
  0x58   :  { %s1680_s12 = scalar_lea.hbm %s2152_s6, 16 }
  0x59   :  { %p1681_p9 = scmp.ne.s32.totalorder %s2152_s6, %s1680_s12  ;;  %p1684_p10 = scmp.lt.u32.totalorder %s1680_s12, %s2152_s6 }
  0x5b   :  { %p1686_p11 = pnand %p1684_p10, %p1681_p9 }
  0x5d   :  { %1689 = shalt.err (!%p1686_p11)
}
  0x5e   :  { %s1690_s4 = scalar_lea.vmem %s83_s23, 16  ;;  %s1694_s25 = scalar_lea.vmem %s83_s23, 32 }
  0x5f   :  { %p1691_p12 = scmp.ne.s32.totalorder %s83_s23, %s1690_s4  ;;  %p1695_p13 = scmp.lt.s32.totalorder %s83_s23, %s83_s23 }
  0x60   :  { %p1696_p0 = scmp.lt.s32.totalorder %s1694_s25, %s1690_s4 }
  0x62   :  { %p1697_p1 = por %p1696_p0, %p1695_p13 }
  0x64   :  { %p1698_p2 = pnand %p1697_p1, %p1691_p12 }
  0x66   :  { %1701 = shalt.err (!%p1698_p2)
}
  0x67   :  { %85 = dma.hbm_to_vmem [thread:$0]  %s2152_s6, 16, %s83_s23, [#allocation11]  }
  0x68   :  { %s1702_s19 = scalar_lea.hbm %s2154_s8, 16 }
  0x69   :  { %p1703_p3 = scmp.ne.s32.totalorder %s2154_s8, %s1702_s19  ;;  %p1706_p4 = scmp.lt.u32.totalorder %s1702_s19, %s2154_s8 }
  0x6b   :  { %p1708_p5 = pnand %p1706_p4, %p1703_p3 }
  0x6d   :  { %1711 = shalt.err (!%p1708_p5)
}
  0x6e   :  { %s1712_s24 = scalar_lea.vmem %s95_s27, 16  ;;  %s1716_s1 = scalar_lea.vmem %s95_s27, 32 }
  0x6f   :  { %p1713_p6 = scmp.ne.s32.totalorder %s95_s27, %s1712_s24  ;;  %p1717_p7 = scmp.lt.s32.totalorder %s95_s27, %s95_s27 }
  0x70   :  { %p1718_p8 = scmp.lt.s32.totalorder %s1716_s1, %s1712_s24 }
  0x72   :  { %p1719_p9 = por %p1718_p8, %p1717_p7 }
  0x74   :  { %p1720_p10 = pnand %p1719_p9, %p1713_p6 }
  0x76   :  { %1723 = shalt.err (!%p1720_p10)
}
  0x77   :  { %97 = dma.hbm_to_vmem [thread:$0]  %s2154_s8, 16, %s95_s27, [#allocation14]  }
  0x78   :  { %1770 = dma.done.wait [#allocation5], 384  }
  0x79   :  { %1771 = vsyncadd [#allocation5], 4294966912 }
  0x7a   :  { %1772 = dma.done.wait [#allocation8], 528  }
  0x7b   :  { %1773 = vsyncadd [#allocation8], 4294966768 }
  0x7c   :  { %1774 = dma.done.wait [#allocation11], 528  }
  0x7d   :  { %1775 = vsyncadd [#allocation11], 4294966768 }
  0x7e   :  { %1776 = dma.done.wait [#allocation14], 16  }
  0x7f   :  { %1777 = vsyncadd [#allocation14], 4294967280  ;;  %v1791_v0 = vmov 0.0|0.0   ;;  %s116_s30 = sld [smem:[#allocation3]]  ;;  %s1264_s23 = sld [smem:[#allocation3 + $0x1]]  ;;  %vm1792_vm0 = vmmov 0   ;;  %v364_v55 = vlaneseq }
  0x80   :  { %1457 = vmatprep.subr.bf16.mxu1 %v1791_v0  ;;  %1451 = vmatprep.subr.bf16.mxu0 %v1791_v0  ;;  %v1793_v1 = vmov 0.0   ;;  %s1265_s8 = sld [smem:[#allocation3 + $0x2]]  ;;  %s1266_s26 = sld [smem:[#allocation3 + $0x3]]  ;;  %v262_v2 = vld [vmem:[#allocation10] sm:$0xff]  ;;  %v263_v3 = vld [vmem:[#allocation10 + $0x8] sm:$0xff]  ;;  %v264_v7 = vld [vmem:[#allocation10 + $0x10] sm:$0xff] }
  0x81   :  { %1360 = vmatprep.mubr.msk.f32.mxu1 %vm1792_vm0, %v1793_v1  ;;  %1349 = vmatprep.mubr.msk.f32.mxu0 %vm1792_vm0, %v1793_v1  ;;  %s1951_s27 = sld [smem:[#allocation3 + $0x4]]  ;;  %s1953_s28 = sld [smem:[#allocation3 + $0x5]]  ;;  %v176_v4 = vld [vmem:[#allocation7] sm:$0xff]  ;;  %v1959_v5 = vpack.c.bf16 %v263_v3, %v262_v2  ;;  %v177_v6 = vld [vmem:[#allocation7 + $0x8] sm:$0xff]  ;;  %v178_v10 = vld [vmem:[#allocation7 + $0x10] sm:$0xff]  ;;  %vm161_vm1 = vcmask 1040384  }
  0x82   :  { %s1955_s11 = sld [smem:[#allocation3 + $0x6]]  ;;  %s1957_s12 = sld [smem:[#allocation3 + $0x7]]  ;;  %v265_v8 = vld [vmem:[#allocation10 + $0x18] sm:$0xff]  ;;  %v1452_v9 = vpack.c.bf16 %v177_v6, %v176_v4  ;;  %vm163_vm2 = vcmask 1041408   ;;  %vm165_vm3 = vcmask 1042432   ;;  %vm187_vm4 = vcmask 261120  }
  0x83   :  { %v179_v11 = vld [vmem:[#allocation7 + $0x18] sm:$0xff]  ;;  %1459 = vmatpush3.bf16.msra.mxu1 %v1959_v5  ;;  %v1962_v12 = vpack.c.bf16 %v265_v8, %v264_v7  ;;  %v261_v26 = vld [vmem:[%s2148_s2] sm:$0x1]  ;;  %vm167_vm5 = vcmask 1043456   ;;  %vm169_vm6 = vcmask 1044480   ;;  %vm171_vm7 = vcmask 1045504  }
  0x84   :  { %1453 = vmatpush3.bf16.msra.mxu0 %v1452_v9  ;;  %1460 = vmatprep.subr.bf16.mxu1 %v1791_v0  ;;  %v1455_v16 = vpack.c.bf16 %v179_v11, %v178_v10  ;;  %vm173_vm8 = vcmask 1046528   ;;  %v1997_v38 = vld [vmem:[#allocation12] sm:$0x1]  ;;  %s1794_s2 = smov 64   ;;  %v1271_v44 = vld [vmem:[#allocation9] ss:$0 sm:$0xff] }
  0x85   :  { %s117_s13 = scalar_lea.vmem [#allocation4], %s116_s30  ;;  %s120_s14 = scalar_lea.vmem [#allocation4], %s1264_s23  ;;  %1454 = vmatprep.subr.bf16.mxu0 %v1791_v0  ;;  %v365_v56 = vshrl.u32 %v364_v55, 7  ;;  %vm1118_vm9 = vcmask 261127  }
  0x86   :  { %v118_v13 = vld [vmem:[%s117_s13] sm:$0x1]  ;;  %s123_s5 = scalar_lea.vmem [#allocation4], %s1265_s8  ;;  %s126_s20 = scalar_lea.vmem [#allocation4], %s1266_s26 }
  0x87   :  { %v121_v14 = vld [vmem:[%s120_s14] sm:$0x1]  ;;  %s129_s4 = scalar_lea.vmem [#allocation4], %s1951_s27  ;;  %s132_s25 = scalar_lea.vmem [#allocation4], %s1953_s28  ;;  %1462 = vmatpush3.bf16.msra.mxu1 %v1962_v12  ;;  %v366_v57 = vsub.s32 0, %v365_v56 }
  0x88   :  { %v124_v15 = vld [vmem:[%s123_s5] sm:$0x1]  ;;  %v141_v20 = vrot.slane %v121_v14, 7  ;;  %s135_s15 = scalar_lea.vmem [#allocation4], %s1955_s11  ;;  %s138_s16 = scalar_lea.vmem [#allocation4], %s1957_s12  ;;  %1456 = vmatpush3.bf16.msra.mxu0 %v1455_v16  ;;  %1469 = vmatprep.subr.bf16.mxu1 %v1791_v0 }
  0x89   :  { %v127_v17 = vld [vmem:[%s126_s20] sm:$0x1]  ;;  %v144_v21 = vrot.slane %v124_v15, 6  ;;  %1463 = vmatprep.subr.bf16.mxu0 %v1791_v0  ;;  %s1795_s19 = smov 96   ;;  %v367_v59 = vrot.slane %v261_v26, %v366_v57  ;;  %s1796_s21 = smov 32  }
  0x8a   :  { %v130_v18 = vld [vmem:[%s129_s4] sm:$0x1]  ;;  %v147_v22 = vrot.slane %v127_v17, 5  ;;  %v162_v28 = vsel %vm161_vm1, %v118_v13, %v141_v20  ;;  %1361 = vmatmul.mubr.msk.f32.vlgmr.msra.gmra.mrb[0].mxu1 %vm187_vm4, %v261_v26 }
  0x8b   :  { %v133_v19 = vld [vmem:[%s132_s25] sm:$0x1]  ;;  %v150_v25 = vrot.slane %v130_v18, 4  ;;  %v164_v30 = vsel %vm163_vm2, %v162_v28, %v144_v21  ;;  %1471 = vmatpush3.bf16.msra.mxu1 %v1959_v5  ;;  %1382 = vmatprep.mubr.msk.f32.mxu1 %vm1792_vm0, %v1793_v1 }
  0x8c   :  { %v136_v23 = vld [vmem:[%s135_s15] sm:$0x1]  ;;  %v153_v27 = vrot.slane %v133_v19, 3  ;;  %v166_v32 = vsel %vm165_vm3, %v164_v30, %v147_v22  ;;  %1472 = vmatprep.subr.bf16.mxu1 %v1791_v0 }
  0x8d   :  { %v139_v24 = vld [vmem:[%s138_s16] sm:$0x1]  ;;  %v156_v29 = vrot.slane %v136_v23, 2  ;;  %v168_v33 = vsel %vm167_vm5, %v166_v32, %v150_v25 }
  0x8e   :  { %v159_v31 = vrot.slane %v139_v24, 1  ;;  %v170_v34 = vsel %vm169_vm6, %v168_v33, %v153_v27 }
  0x8f   :  { %v172_v35 = vsel %vm171_vm7, %v170_v34, %v156_v29  ;;  %1474 = vmatpush3.bf16.msra.mxu1 %v1962_v12 }
  0x90   :  { %v174_v36 = vsel %vm173_vm8, %v172_v35, %v159_v31  ;;  %1481 = vmatprep.subr.bf16.mxu1 %v1791_v0 }
  0x91   :  { %v175_v37 = vmax.f32 %v174_v36, 0.0 }
  0x93   :  { %1350 = vmatmul.mubr.msk.f32.vlgmr.msra.gmra.mrb[0].mxu0 %vm187_vm4, %v175_v37 }
  0x94   :  { %1465 = vmatpush3.bf16.msra.mxu0 %v1959_v5  ;;  %1371 = vmatprep.mubr.msk.f32.mxu0 %vm1792_vm0, %v1793_v1 }
  0x95   :  { %1466 = vmatprep.subr.bf16.mxu0 %v1791_v0 }
  0x98   :  { %1468 = vmatpush3.bf16.msra.mxu0 %v1962_v12 }
  0x99   :  { %1475 = vmatprep.subr.bf16.mxu0 %v1791_v0 }
 0x15d   :  { %v336_v39 = vpop.f32.mrb[0].mxu1 }
 0x15e   :  { %v337_v40 = vadd.f32 %v336_v39, %v1997_v38  ;;  %v1362_v41 = vpop.f32.mrb[1].mxu1 }
 0x160   :  { %348 = vrot.lane.b32.xlu0 %v337_v40, %s1794_s2 }
 0x166   :  { %v257_v42 = vpop.f32.mrb[0].mxu0 }
 0x167   :  { %v1351_v43 = vpop.f32.mrb[1].mxu0  ;;  %v2001_v45 = vadd.f32 %v1271_v44, %v257_v42 }
 0x169   :  { %v340_v46 = vadd.f32 %v337_v40, %v2001_v45 }
 0x16b   :  { %v1274_v47 = vmul.f32 -1.442695, %v340_v46 }
 0x16d   :  { %1528 = vpow2.f32 %v1274_v47 }
 0x177   :  { %v1529_v48 = vpop.eup %1528 }
 0x178   :  { %v344_v49 = vadd.f32 1.0, %v1529_v48 }
 0x17a   :  { %1530 = vrcp.f32 %v344_v49 }
 0x184   :  { %v1531_v50 = vpop.eup %1530 }
 0x185   :  { %v358_v61 = vsub.f32 1.0, %v1531_v50 }
 0x1d2   :  { %v349_v51 = vpop.permute.xlu0 %348 }
 0x1d3   :  { %v351_v52 = vmul.f32 %v1531_v50, %v349_v51 }
 0x1d5   :  { %353 = vrot.lane.b32.xlu0 %v351_v52, %s1794_s2 }
 0x247   :  { %v354_v53 = vpop.permute.xlu0 %353 }
 0x248   :  { %v356_v54 = vadd.f32 %v354_v53, %v2001_v45 }
 0x24a   :  { %1532 = vtanh.f32 %v356_v54 }
 0x254   :  { %v1533_v58 = vpop.eup %1532 }
 0x255   :  { %360 = vrot.lane.b32.xlu1 %v1533_v58, %s1795_s19 }
 0x259   :  { %368 = vrot.lane.b32.xlu1 %v367_v59, %s1796_s21 }
 0x2c7   :  { %v361_v60 = vpop.permute.xlu1 %360 }
 0x2c8   :  { %v363_v63 = vmul.f32 %v361_v60, %v358_v61 }
 0x2cb   :  { %v369_v62 = vpop.permute.xlu1 %368 }
 0x2cc   :  { %v371_v2 = vmul.f32 %v1531_v50, %v369_v62 }
 0x2ce   :  { %v2007_v3 = vadd.f32 %v371_v2, %v363_v63 }
 0x2d0   :  { %374 = vrot.lane.b32.xlu0 %v2007_v3, %s1795_s19  ;;  %v474_v22 = vrot.slane %v2007_v3, 7 }
 0x342   :  { %v375_v4 = vpop.permute.xlu0 %374 }
 0x343   :  { %1372 = vmatmul.mubr.msk.f32.vlgmr.msra.gmra.mrb[2].mxu0 %vm187_vm4, %v375_v4 }
 0x344   :  { %1477 = vmatpush3.bf16.msra.mxu0 %v1959_v5  ;;  %1393 = vmatprep.mubr.msk.f32.mxu0 %vm1792_vm0, %v1793_v1 }
 0x345   :  { %1478 = vmatprep.subr.bf16.mxu0 %v1791_v0 }
 0x348   :  { %1480 = vmatpush3.bf16.msra.mxu0 %v1962_v12 }
 0x349   :  { %1487 = vmatprep.subr.bf16.mxu0 %v1791_v0 }
 0x416   :  { %v444_v6 = vpop.f32.mrb[2].mxu0 }
 0x417   :  { %v445_v7 = vadd.f32 %v444_v6, %v1997_v38  ;;  %v1373_v8 = vpop.f32.mrb[3].mxu0 }
 0x419   :  { %v449_v9 = vrot.slane %v445_v7, 7 }
 0x41b   :  { %458 = vrot.lane.b32.xlu1 %v449_v9, %s1794_s2  ;;  %v451_v10 = vadd.f32 %v449_v9, %v2001_v45 }
 0x41d   :  { %v1276_v11 = vmul.f32 -1.442695, %v451_v10 }
 0x41f   :  { %1534 = vpow2.f32 %v1276_v11 }
 0x429   :  { %v1535_v13 = vpop.eup %1534 }
 0x42a   :  { %v455_v14 = vadd.f32 1.0, %v1535_v13 }
 0x42c   :  { %1536 = vrcp.f32 %v455_v14 }
 0x436   :  { %v1537_v15 = vpop.eup %1536 }
 0x437   :  { %v468_v21 = vsub.f32 1.0, %v1537_v15  ;;  %v476_v24 = vmul.f32 %v1537_v15, %v474_v22 }
 0x48d   :  { %v459_v16 = vpop.permute.xlu1 %458 }
 0x48e   :  { %v461_v17 = vmul.f32 %v1537_v15, %v459_v16 }
 0x490   :  { %463 = vrot.lane.b32.xlu0 %v461_v17, %s1794_s2 }
 0x502   :  { %v464_v18 = vpop.permute.xlu0 %463 }
 0x503   :  { %v466_v19 = vadd.f32 %v464_v18, %v2001_v45 }
 0x505   :  { %1538 = vtanh.f32 %v466_v19 }
 0x50f   :  { %v1539_v20 = vpop.eup %1538 }
 0x510   :  { %470 = vrot.lane.b32.xlu1 %v1539_v20, %s1795_s19 }
 0x582   :  { %v471_v23 = vpop.permute.xlu1 %470 }
 0x583   :  { %v473_v25 = vmul.f32 %v471_v23, %v468_v21 }
 0x585   :  { %v477_v26 = vadd.f32 %v476_v24, %v473_v25 }
 0x587   :  { %v479_v27 = vrot.slane %v477_v26, 1  ;;  %v580_v46 = vrot.slane %v477_v26, 7  ;;  %v1120_v51 = vsel %vm161_vm1, %v2007_v3, %v477_v26 }
 0x589   :  { %480 = vrot.lane.b32.xlu0 %v479_v27, %s1795_s19 }
 0x5fb   :  { %v481_v28 = vpop.permute.xlu0 %480 }
 0x5fc   :  { %1383 = vmatmul.mubr.msk.f32.vlgmr.msra.gmra.mrb[2].mxu1 %vm187_vm4, %v481_v28 }
 0x5fd   :  { %1483 = vmatpush3.bf16.msra.mxu1 %v1959_v5  ;;  %1404 = vmatprep.mubr.msk.f32.mxu1 %vm1792_vm0, %v1793_v1 }
 0x5fe   :  { %1484 = vmatprep.subr.bf16.mxu1 %v1791_v0 }
 0x601   :  { %1486 = vmatpush3.bf16.msra.mxu1 %v1962_v12 }
 0x602   :  { %1493 = vmatprep.subr.bf16.mxu1 %v1791_v0 }
 0x6cf   :  { %v550_v29 = vpop.f32.mrb[2].mxu1 }
 0x6d0   :  { %v551_v30 = vadd.f32 %v550_v29, %v1997_v38  ;;  %v1384_v31 = vpop.f32.mrb[3].mxu1 }
 0x6d2   :  { %v555_v32 = vrot.slane %v551_v30, 6 }
 0x6d4   :  { %564 = vrot.lane.b32.xlu1 %v555_v32, %s1794_s2  ;;  %v557_v33 = vadd.f32 %v555_v32, %v2001_v45 }
 0x6d6   :  { %v1278_v34 = vmul.f32 -1.442695, %v557_v33 }
 0x6d8   :  { %1540 = vpow2.f32 %v1278_v34 }
 0x6e2   :  { %v1541_v35 = vpop.eup %1540 }
 0x6e3   :  { %v561_v36 = vadd.f32 1.0, %v1541_v35 }
 0x6e5   :  { %1542 = vrcp.f32 %v561_v36 }
 0x6ef   :  { %v1543_v37 = vpop.eup %1542 }
 0x6f0   :  { %v574_v44 = vsub.f32 1.0, %v1543_v37  ;;  %v582_v48 = vmul.f32 %v1543_v37, %v580_v46 }
 0x746   :  { %v565_v39 = vpop.permute.xlu1 %564 }
 0x747   :  { %v567_v40 = vmul.f32 %v1543_v37, %v565_v39 }
 0x749   :  { %569 = vrot.lane.b32.xlu0 %v567_v40, %s1794_s2 }
 0x7bb   :  { %v570_v41 = vpop.permute.xlu0 %569 }
 0x7bc   :  { %v572_v42 = vadd.f32 %v570_v41, %v2001_v45 }
 0x7be   :  { %1544 = vtanh.f32 %v572_v42 }
 0x7c8   :  { %v1545_v43 = vpop.eup %1544 }
 0x7c9   :  { %576 = vrot.lane.b32.xlu1 %v1545_v43, %s1795_s19 }
 0x83b   :  { %v577_v47 = vpop.permute.xlu1 %576 }
 0x83c   :  { %v579_v49 = vmul.f32 %v577_v47, %v574_v44 }
 0x83e   :  { %v583_v50 = vadd.f32 %v582_v48, %v579_v49 }
 0x840   :  { %v1121_v52 = vsel %vm163_vm2, %v1120_v51, %v583_v50  ;;  %v585_v53 = vrot.slane %v583_v50, 2  ;;  %v686_v9 = vrot.slane %v583_v50, 7 }
 0x842   :  { %586 = vrot.lane.b32.xlu0 %v585_v53, %s1795_s19 }
 0x8b4   :  { %v587_v54 = vpop.permute.xlu0 %586 }
 0x8b5   :  { %1394 = vmatmul.mubr.msk.f32.vlgmr.msra.gmra.mrb[4].mxu0 %vm187_vm4, %v587_v54 }
 0x8b6   :  { %1489 = vmatpush3.bf16.msra.mxu0 %v1959_v5  ;;  %1415 = vmatprep.mubr.msk.f32.mxu0 %vm1792_vm0, %v1793_v1 }
 0x8b7   :  { %1490 = vmatprep.subr.bf16.mxu0 %v1791_v0 }
 0x8ba   :  { %1492 = vmatpush3.bf16.msra.mxu0 %v1962_v12 }
 0x8bb   :  { %1499 = vmatprep.subr.bf16.mxu0 %v1791_v0 }
 0x988   :  { %v656_v55 = vpop.f32.mrb[4].mxu0 }
 0x989   :  { %v657_v56 = vadd.f32 %v656_v55, %v1997_v38  ;;  %v1395_v57 = vpop.f32.mrb[5].mxu0 }
 0x98b   :  { %v661_v58 = vrot.slane %v657_v56, 5 }
 0x98d   :  { %670 = vrot.lane.b32.xlu1 %v661_v58, %s1794_s2  ;;  %v663_v59 = vadd.f32 %v661_v58, %v2001_v45 }
 0x98f   :  { %v1280_v60 = vmul.f32 -1.442695, %v663_v59 }
 0x991   :  { %1546 = vpow2.f32 %v1280_v60 }
 0x99b   :  { %v1547_v61 = vpop.eup %1546 }
 0x99c   :  { %v667_v62 = vadd.f32 1.0, %v1547_v61 }
 0x99e   :  { %1548 = vrcp.f32 %v667_v62 }
 0x9a8   :  { %v1549_v63 = vpop.eup %1548 }
 0x9a9   :  { %v680_v8 = vsub.f32 1.0, %v1549_v63  ;;  %v688_v11 = vmul.f32 %v1549_v63, %v686_v9 }
 0x9ff   :  { %v671_v2 = vpop.permute.xlu1 %670 }
 0xa00   :  { %v673_v3 = vmul.f32 %v1549_v63, %v671_v2 }
 0xa02   :  { %675 = vrot.lane.b32.xlu0 %v673_v3, %s1794_s2 }
 0xa74   :  { %v676_v4 = vpop.permute.xlu0 %675 }
 0xa75   :  { %v678_v6 = vadd.f32 %v676_v4, %v2001_v45 }
 0xa77   :  { %1550 = vtanh.f32 %v678_v6 }
 0xa81   :  { %v1551_v7 = vpop.eup %1550 }
 0xa82   :  { %682 = vrot.lane.b32.xlu1 %v1551_v7, %s1795_s19 }
 0xaf4   :  { %v683_v10 = vpop.permute.xlu1 %682 }
 0xaf5   :  { %v685_v13 = vmul.f32 %v683_v10, %v680_v8 }
 0xaf7   :  { %v689_v14 = vadd.f32 %v688_v11, %v685_v13 }
 0xaf9   :  { %v1122_v15 = vsel %vm165_vm3, %v1121_v52, %v689_v14  ;;  %v691_v16 = vrot.slane %v689_v14, 3  ;;  %v792_v33 = vrot.slane %v689_v14, 7 }
 0xafb   :  { %692 = vrot.lane.b32.xlu0 %v691_v16, %s1795_s19 }
 0xb6d   :  { %v693_v17 = vpop.permute.xlu0 %692 }
 0xb6e   :  { %1405 = vmatmul.mubr.msk.f32.vlgmr.msra.gmra.mrb[4].mxu1 %vm187_vm4, %v693_v17 }
 0xb6f   :  { %1495 = vmatpush3.bf16.msra.mxu1 %v1959_v5  ;;  %1426 = vmatprep.mubr.msk.f32.mxu1 %vm1792_vm0, %v1793_v1 }
 0xb70   :  { %1496 = vmatprep.subr.bf16.mxu1 %v1791_v0 }
 0xb73   :  { %1498 = vmatpush3.bf16.msra.mxu1 %v1962_v12 }
 0xb74   :  { %1505 = vmatprep.subr.bf16.mxu1 %v1791_v0 }
 0xc41   :  { %v762_v18 = vpop.f32.mrb[4].mxu1 }
 0xc42   :  { %v763_v19 = vadd.f32 %v762_v18, %v1997_v38  ;;  %v1406_v20 = vpop.f32.mrb[5].mxu1 }
 0xc44   :  { %v767_v21 = vrot.slane %v763_v19, 4 }
 0xc46   :  { %776 = vrot.lane.b32.xlu1 %v767_v21, %s1794_s2  ;;  %v769_v22 = vadd.f32 %v767_v21, %v2001_v45 }
 0xc48   :  { %v1282_v23 = vmul.f32 -1.442695, %v769_v22 }
 0xc4a   :  { %1552 = vpow2.f32 %v1282_v23 }
 0xc54   :  { %v1553_v24 = vpop.eup %1552 }
 0xc55   :  { %v773_v25 = vadd.f32 1.0, %v1553_v24 }
 0xc57   :  { %1554 = vrcp.f32 %v773_v25 }
 0xc61   :  { %v1555_v26 = vpop.eup %1554 }
 0xc62   :  { %v786_v32 = vsub.f32 1.0, %v1555_v26  ;;  %v794_v35 = vmul.f32 %v1555_v26, %v792_v33 }
 0xcb8   :  { %v777_v27 = vpop.permute.xlu1 %776 }
 0xcb9   :  { %v779_v28 = vmul.f32 %v1555_v26, %v777_v27 }
 0xcbb   :  { %781 = vrot.lane.b32.xlu0 %v779_v28, %s1794_s2 }
 0xd2d   :  { %v782_v29 = vpop.permute.xlu0 %781 }
 0xd2e   :  { %v784_v30 = vadd.f32 %v782_v29, %v2001_v45 }
 0xd30   :  { %1556 = vtanh.f32 %v784_v30 }
 0xd3a   :  { %v1557_v31 = vpop.eup %1556 }
 0xd3b   :  { %788 = vrot.lane.b32.xlu1 %v1557_v31, %s1795_s19 }
 0xdad   :  { %v789_v34 = vpop.permute.xlu1 %788 }
 0xdae   :  { %v791_v36 = vmul.f32 %v789_v34, %v786_v32 }
 0xdb0   :  { %v795_v37 = vadd.f32 %v794_v35, %v791_v36 }
 0xdb2   :  { %v1123_v39 = vsel %vm167_vm5, %v1122_v15, %v795_v37  ;;  %v797_v40 = vrot.slane %v795_v37, 4  ;;  %v898_v56 = vrot.slane %v795_v37, 7 }
 0xdb4   :  { %798 = vrot.lane.b32.xlu0 %v797_v40, %s1795_s19  ;;  %v1128_v40 = vld [vmem:[%s2153_s7 + $0x8] sm:$0xff] }
 0xe26   :  { %v799_v41 = vpop.permute.xlu0 %798 }
 0xe27   :  { %1416 = vmatmul.mubr.msk.f32.vlgmr.msra.gmra.mrb[6].mxu0 %vm187_vm4, %v799_v41  ;;  %v1129_v41 = vld [vmem:[%s2153_s7 + $0x10] sm:$0xff] }
 0xe28   :  { %1501 = vmatpush3.bf16.msra.mxu0 %v1959_v5  ;;  %1437 = vmatprep.mubr.msk.f32.mxu0 %vm1792_vm0, %v1793_v1 }
 0xe29   :  { %1502 = vmatprep.subr.bf16.mxu0 %v1791_v0 }
 0xe2c   :  { %1504 = vmatpush3.bf16.msra.mxu0 %v1962_v12 }
 0xefa   :  { %v868_v42 = vpop.f32.mrb[6].mxu0 }
 0xefb   :  { %v869_v43 = vadd.f32 %v868_v42, %v1997_v38  ;;  %v1417_v44 = vpop.f32.mrb[7].mxu0 }
 0xefd   :  { %v873_v46 = vrot.slane %v869_v43, 3  ;;  %v1130_v43 = vld [vmem:[%s2153_s7 + $0x18] sm:$0xff] }
 0xeff   :  { %882 = vrot.lane.b32.xlu1 %v873_v46, %s1794_s2  ;;  %v875_v47 = vadd.f32 %v873_v46, %v2001_v45 }
 0xf01   :  { %v1284_v48 = vmul.f32 -1.442695, %v875_v47 }
 0xf03   :  { %1558 = vpow2.f32 %v1284_v48 }
 0xf0d   :  { %v1559_v49 = vpop.eup %1558 }
 0xf0e   :  { %v879_v5 = vadd.f32 1.0, %v1559_v49 }
 0xf10   :  { %1560 = vrcp.f32 %v879_v5 }
 0xf1a   :  { %v1561_v50 = vpop.eup %1560 }
 0xf1b   :  { %v892_v55 = vsub.f32 1.0, %v1561_v50  ;;  %v900_v58 = vmul.f32 %v1561_v50, %v898_v56 }
 0xf71   :  { %v883_v51 = vpop.permute.xlu1 %882 }
 0xf72   :  { %v885_v52 = vmul.f32 %v1561_v50, %v883_v51 }
 0xf74   :  { %887 = vrot.lane.b32.xlu0 %v885_v52, %s1794_s2 }
 0xfe6   :  { %v888_v12 = vpop.permute.xlu0 %887 }
 0xfe7   :  { %v890_v53 = vadd.f32 %v888_v12, %v2001_v45  ;;  %v1289_v12 = vld [vmem:[#allocation13] ss:$0 sm:$0xff] }
 0xfe9   :  { %1562 = vtanh.f32 %v890_v53 }
 0xff3   :  { %v1563_v54 = vpop.eup %1562 }
 0xff4   :  { %894 = vrot.lane.b32.xlu1 %v1563_v54, %s1795_s19 }
0x1066   :  { %v895_v57 = vpop.permute.xlu1 %894 }
0x1067   :  { %v897_v59 = vmul.f32 %v895_v57, %v892_v55 }
0x1069   :  { %v901_v60 = vadd.f32 %v900_v58, %v897_v59 }
0x106b   :  { %v903_v61 = vrot.slane %v901_v60, 5  ;;  %v1124_v62 = vsel %vm169_vm6, %v1123_v39, %v901_v60  ;;  %v1004_v18 = vrot.slane %v901_v60, 7 }
0x106d   :  { %904 = vrot.lane.b32.xlu0 %v903_v61, %s1795_s19 }
0x10df   :  { %v905_v63 = vpop.permute.xlu0 %904 }
0x10e0   :  { %1427 = vmatmul.mubr.msk.f32.vlgmr.msra.gmra.mrb[6].mxu1 %vm187_vm4, %v905_v63 }
0x10e1   :  { %1448 = vmatprep.mubr.msk.f32.mxu1 %vm1792_vm0, %v1793_v1 }
0x11b3   :  { %v974_v2 = vpop.f32.mrb[6].mxu1 }
0x11b4   :  { %v975_v3 = vadd.f32 %v974_v2, %v1997_v38  ;;  %v1428_v4 = vpop.f32.mrb[7].mxu1 }
0x11b6   :  { %v979_v6 = vrot.slane %v975_v3, 2 }
0x11b8   :  { %988 = vrot.lane.b32.xlu1 %v979_v6, %s1794_s2  ;;  %v981_v7 = vadd.f32 %v979_v6, %v2001_v45 }
0x11ba   :  { %v1286_v8 = vmul.f32 -1.442695, %v981_v7 }
0x11bc   :  { %1564 = vpow2.f32 %v1286_v8 }
0x11c6   :  { %v1565_v9 = vpop.eup %1564 }
0x11c7   :  { %v985_v10 = vadd.f32 1.0, %v1565_v9 }
0x11c9   :  { %1566 = vrcp.f32 %v985_v10 }
0x11d3   :  { %v1567_v11 = vpop.eup %1566 }
0x11d4   :  { %v998_v17 = vsub.f32 1.0, %v1567_v11  ;;  %v1006_v20 = vmul.f32 %v1567_v11, %v1004_v18 }
0x122a   :  { %v989_v13 = vpop.permute.xlu1 %988 }
0x122b   :  { %v991_v14 = vmul.f32 %v1567_v11, %v989_v13 }
0x122d   :  { %993 = vrot.lane.b32.xlu0 %v991_v14, %s1794_s2 }
0x129f   :  { %v994_v1 = vpop.permute.xlu0 %993 }
0x12a0   :  { %v996_v15 = vadd.f32 %v994_v1, %v2001_v45 }
0x12a2   :  { %1568 = vtanh.f32 %v996_v15 }
0x12ac   :  { %v1569_v16 = vpop.eup %1568 }
0x12ad   :  { %1000 = vrot.lane.b32.xlu1 %v1569_v16, %s1795_s19 }
0x131f   :  { %v1001_v19 = vpop.permute.xlu1 %1000 }
0x1320   :  { %v1003_v21 = vmul.f32 %v1001_v19, %v998_v17 }
0x1322   :  { %v1007_v22 = vadd.f32 %v1006_v20, %v1003_v21 }
0x1324   :  { %v1009_v23 = vrot.slane %v1007_v22, 6  ;;  %v1125_v24 = vsel %vm171_vm7, %v1124_v62, %v1007_v22  ;;  %v1110_v47 = vrot.slane %v1007_v22, 7 }
0x1326   :  { %1010 = vrot.lane.b32.xlu0 %v1009_v23, %s1795_s19 }
0x1398   :  { %v1011_v25 = vpop.permute.xlu0 %1010 }
0x1399   :  { %1438 = vmatmul.mubr.msk.f32.vlgmr.msra.gmra.mrb[8].mxu0 %vm187_vm4, %v1011_v25 }
0x146c   :  { %v1080_v26 = vpop.f32.mrb[8].mxu0 }
0x146d   :  { %v1081_v27 = vadd.f32 %v1080_v26, %v1997_v38  ;;  %v1439_v28 = vpop.f32.mrb[9].mxu0  ;;  %v1127_v38 = vld [vmem:[%s2153_s7] sm:$0xff]  ;;  %s1797_s7 = smov [#allocation16]  }
0x146e   :  { %v1506_v42 = vpack.c.bf16 %v1128_v40, %v1127_v38  ;;  %s1240_s23 = sshll.u32 %s1797_s7, 4  ;;  %s1241_s23 = int_to_ptr.vmem [resolvable:$true] %s1240_s23 }
0x146f   :  { %v1085_v29 = vrot.slane %v1081_v27, 1  ;;  %s1724_s8 = scalar_lea.vmem %s1241_s23, 16  ;;  %s1728_s26 = scalar_lea.vmem %s1241_s23, 32 }
0x1470   :  { %1507 = vmatpush3.bf16.msra.mxu1 %v1506_v42  ;;  %p1725_p11 = scmp.ne.s32.totalorder %s1241_s23, %s1724_s8  ;;  %p1729_p12 = scmp.lt.s32.totalorder %s1241_s23, %s1241_s23 }
0x1471   :  { %1094 = vrot.lane.b32.xlu1 %v1085_v29, %s1794_s2  ;;  %v1087_v30 = vadd.f32 %v1085_v29, %v2001_v45  ;;  %1508 = vmatprep.subr.bf16.mxu1 %v1791_v0  ;;  %p1730_p13 = scmp.lt.s32.totalorder %s1728_s26, %s1724_s8 }
0x1473   :  { %v1288_v31 = vmul.f32 -1.442695, %v1087_v30  ;;  %p1731_p0 = por %p1730_p13, %p1729_p12 }
0x1475   :  { %1570 = vpow2.f32 %v1288_v31  ;;  %p1732_p1 = pnand %p1731_p0, %p1725_p11 }
0x147f   :  { %v1571_v32 = vpop.eup %1570 }
0x1480   :  { %v1091_v33 = vadd.f32 1.0, %v1571_v32 }
0x1482   :  { %1572 = vrcp.f32 %v1091_v33 }
0x148c   :  { %v1573_v34 = vpop.eup %1572 }
0x148d   :  { %v1104_v46 = vsub.f32 1.0, %v1573_v34  ;;  %v1112_v49 = vmul.f32 %v1573_v34, %v1110_v47 }
0x14e3   :  { %v1095_v35 = vpop.permute.xlu1 %1094 }
0x14e4   :  { %v1097_v36 = vmul.f32 %v1573_v34, %v1095_v35 }
0x14e6   :  { %1099 = vrot.lane.b32.xlu0 %v1097_v36, %s1794_s2 }
0x1558   :  { %v1100_v37 = vpop.permute.xlu0 %1099 }
0x1559   :  { %v1102_v39 = vadd.f32 %v1100_v37, %v2001_v45  ;;  %v1509_v45 = vpack.c.bf16 %v1130_v43, %v1129_v41 }
0x155b   :  { %1574 = vtanh.f32 %v1102_v39  ;;  %1510 = vmatpush3.bf16.msra.mxu1 %v1509_v45 }
0x1565   :  { %v1575_v44 = vpop.eup %1574 }
0x1566   :  { %1106 = vrot.lane.b32.xlu1 %v1575_v44, %s1795_s19 }
0x15d8   :  { %v1107_v48 = vpop.permute.xlu1 %1106 }
0x15d9   :  { %v1109_v5 = vmul.f32 %v1107_v48, %v1104_v46 }
0x15db   :  { %v1113_v50 = vadd.f32 %v1112_v49, %v1109_v5 }
0x15dd   :  { %v1126_v51 = vsel %vm173_vm8, %v1125_v24, %v1113_v50 }
0x15de   :  { %1139 = vrot.lane.b32.xlu0 %v1126_v51, %s1795_s19 }
0x1650   :  { %v1140_v52 = vpop.permute.xlu0 %1139 }
0x1651   :  { %1449 = vmatmul.mubr.msk.f32.vlgmr.msra.gmra.mrb[8].mxu1 %vm187_vm4, %v1140_v52 }
0x1724   :  { %v1209_v53 = vpop.f32.mrb[8].mxu1 }
0x1725   :  { %v1210_v0 = vadd.f32 %v1289_v12, %v1209_v53  ;;  %v1450_v54 = vpop.f32.mrb[9].mxu1 }
0x1727   :  { %1213 = vmax.xlane.f32.xlu1 %v1210_v0 }
0x17b4   :  { %v1214_v55 = vpop.xlane.xlu1 %1213 }
0x17b5   :  { %v1215_v56 = vsub.f32 %v1210_v0, %v1214_v55 }
0x17b7   :  { %v1216_v57 = vmul.f32 1.442695, %v1215_v56 }
0x17b9   :  { %1576 = vpow2.f32 %v1216_v57 }
0x17c3   :  { %v1577_v58 = vpop.eup %1576 }
0x17c4   :  { %1218 = vadd.xlane.f32.xlu0 %v1577_v58 }
0x17da   :  { %1115 = vrot.lane.b32.xlu0 %v1113_v50, %s1795_s19 }
0x1851   :  { %v1219_v59 = vpop.xlane.xlu0 %1218 }
0x1852   :  { %1578 = vlog2.f32 %v1219_v59 }
0x1855   :  { %v1116_v60 = vpop.permute.xlu0 %1115 }
0x1856   :  { %1119 = vst.msk [vmem:[#allocation16 - $0x7] sm:$0x80] %vm1118_vm9, %v1116_v60 }
0x1857   :  { %1735 = shalt.err (!%p1732_p1)
}
0x1858   :  { %s1736_s11 = scalar_lea.hbm %s2156_s10, 16 }
0x1859   :  { %p1737_p2 = scmp.ne.s32.totalorder %s2156_s10, %s1736_s11  ;;  %p1740_p3 = scmp.lt.u32.totalorder %s1736_s11, %s2156_s10 }
0x185b   :  { %p1742_p4 = pnand %p1740_p3, %p1737_p2 }
0x185d   :  { %1745 = shalt.err (!%p1742_p4)
}
0x185e   :  { %1243 = dma.vmem_to_hbm [thread:$0]  %s1241_s23, 16, %s2156_s10, [#allocation17]   ;;  %v1579_v61 = vpop.eup %1578 }
0x185f   :  { %s1798_s25 = smov [#allocation15]   ;;  %v1221_v62 = vmul.f32 0.6931472, %v1579_v61 }
0x1860   :  { %s1230_s15 = sshll.u32 %s1798_s25, 4  ;;  %s1231_s15 = int_to_ptr.vmem [resolvable:$true] %s1230_s15 }
0x1861   :  { %v1222_v63 = vsub.f32 %v1215_v56, %v1221_v62  ;;  %s1746_s16 = scalar_lea.vmem %s1231_s15, 128  ;;  %p1751_p6 = scmp.lt.s32.totalorder %s1231_s15, %s1231_s15 }
0x1862   :  { %p1747_p5 = scmp.ne.s32.totalorder %s1231_s15, %s1746_s16  ;;  %p1752_p7 = scmp.lt.s32.totalorder %s1746_s16, %s1746_s16 }
0x1863   :  { %1223 = vst [vmem:[#allocation15] sm:$0xff] %v1222_v63 }
0x1864   :  { %p1753_p8 = por %p1752_p7, %p1751_p6 }
0x1866   :  { %p1754_p9 = pnand %p1753_p8, %p1747_p5 }
0x1868   :  { %1757 = shalt.err (!%p1754_p9)
}
0x1869   :  { %s1758_s2 = scalar_lea.hbm %s2155_s9, 128 }
0x186a   :  { %p1759_p10 = scmp.ne.s32.totalorder %s2155_s9, %s1758_s2  ;;  %p1762_p11 = scmp.lt.u32.totalorder %s1758_s2, %s2155_s9 }
0x186c   :  { %p1764_p12 = pnand %p1762_p11, %p1759_p10 }
0x186e   :  { %1767 = shalt.err (!%p1764_p12)
}
0x186f   :  { %1233 = dma.vmem_to_hbm [thread:$0]  %s1231_s15, 128, %s2155_s9, [#allocation6]  }
0x1870   :  { %1778 = dma.done.wait [#allocation6], 128  }
0x1871   :  { %1779 = vsyncadd [#allocation6], 4294967168 }
0x1872   :  { %1780 = dma.done.wait [#allocation17], 16  }
0x1873   :  { %1781 = vsyncadd [#allocation17], 4294967280 }
0x1874   :  { %1250 = vsyncpa [#allocation5], 1 }
0x1875   :  { %1251 = vsyncpa [#allocation8], 1 }
0x1876   :  { %1252 = vsyncpa [#allocation11], 1 }
0x1877   :  { %1253 = vsyncpa [#allocation14], 1 }
0x1878   :  { %1254 = vsyncpa [#allocation6], 1 }
0x1879   :  { %1255 = vsyncpa [#allocation17], 1 }

</bundles_post_ra>
